<compile_context>
chip_gen: v5e
topology: v5e:2x2
jax: 0.10.0
libtpu: 0.0.40
codegen_flags: <defaults>
</compile_context>

<pallas_src>
import jax
import jax.numpy as jnp
import numpy as np
from jax.experimental import pallas as pl
from jax.experimental.pallas import tpu as pltpu

LATENT_DIM = 32
NUM_HEADS = 4
HEAD_DIM = LATENT_DIM // NUM_HEADS
LN_EPS = 1e-5
_LANE = 128          # TPU lane width; batch tile for large batches (sweep 128-256)


def _comm_agg_kernel(own_t_ref, comm_ref, w_ref, aux_ref, out_ref):
    """Transposed (features-on-sublanes, batch-on-lanes) fused attention block.

    own_t_ref : (D, TB)      own states, transposed (batch on lanes)
    comm_ref  : (TB, N, D)   messages, native batch-major layout
    w_ref     : (5D, D)      [Wq/sqrt(hd); Wk; Wv; Wo; block-diag head mask]
    aux_ref   : (D, 8)       cols = [bq/sqrt(hd), bv, bo, gamma, beta, 0, 0, 0]
    out_ref   : (D, TB)      LayerNorm(attn_out + own), transposed
    """
    D = own_t_ref.shape[0]
    N = comm_ref.shape[1]

    w = w_ref[...]
    wq_s  = w[0 * D:1 * D, :]        # (D, D)   Wq pre-scaled by 1/sqrt(head_dim)
    wkv   = w[1 * D:3 * D, :]        # (2D, D)  [Wk; Wv] stacked
    wo    = w[3 * D:4 * D, :]        # (D, D)
    smask = w[4 * D:5 * D, :]        # (D, D)   1 within a head, 0 elsewhere

    bq_s  = aux_ref[:, 0:1]          # (D, 1) column vectors, broadcast over lanes
    bv    = aux_ref[:, 1:2]
    bo    = aux_ref[:, 2:3]
    gamma = aux_ref[:, 3:4]
    beta  = aux_ref[:, 4:5]

    own_t = own_t_ref[...]                                              # (D, TB)

    # Scaled query, transposed: q_s[d, b] = (own[b] @ Wq.T + bq)[d] / sqrt(hd).
    q_s = jnp.dot(wq_s, own_t, preferred_element_type=jnp.float32) + bq_s

    def kv_and_scores(n):
        comm_n = comm_ref[:, n, :]                                      # (TB, D)
        # kv[d, b] = (Wk|Wv) @ comm[b, n, :] -- transposed-RHS matmul keeps the
        # result batch-on-lanes with no wrapper-side HBM transpose of comm.
        kv = jnp.dot(wkv, comm_n.T, preferred_element_type=jnp.float32)  # (2D, TB)
        k_t = kv[0:D, :]
        v_t = kv[D:2 * D, :]
        # Head-replicated scores: s[d,b] = sum_{d' in head(d)} q_s[d',b]*k[d',b].
        s = jnp.dot(smask, q_s * k_t, preferred_element_type=jnp.float32)  # (D, TB)
        return s, v_t

    # Streaming (online) softmax over the message axis; only m / l / acc stay
    # live.  bk is omitted: it shifts all N scores of a (head, batch) column by
    # the same constant, which softmax is exactly invariant to.
    s, v_t = kv_and_scores(0)
    m = s
    l = jnp.ones_like(s)             # exp(s - m) == 1 for the first message
    acc = v_t
    for n in range(1, N):            # N small & static -> unrolled at trace time
        s, v_t = kv_and_scores(n)
        m_new = jnp.maximum(m, s)
        alpha = jnp.exp(m - m_new)
        p = jnp.exp(s - m_new)
        l = alpha * l + p
        acc = alpha * acc + p * v_t
        m = m_new

    # ctx = acc / l + bv  (bv folded in post-normalisation: sum(attn) == 1).
    # EUP reciprocal + one Newton step: error ~1e-8, far inside 1e-4 tolerance.
    r = pl.reciprocal(l, approx=True)
    r = r * (2.0 - l * r)
    ctx = acc * r + bv                                                  # (D, TB)

    # Output projection + residual + LayerNorm, all lane-dense.
    attn_out = jnp.dot(wo, ctx, preferred_element_type=jnp.float32) + bo
    y = attn_out + own_t
    mean = jnp.mean(y, axis=0, keepdims=True)                           # (1, TB)
    var = jnp.mean((y - mean) ** 2, axis=0, keepdims=True)
    out_ref[...] = (y - mean) * jax.lax.rsqrt(var + LN_EPS) * gamma + beta


def _round_up(x, m):
    return (x + m - 1) // m * m


def _tiling(batch):
    """Return (padded batch, lane tile).  Small batches run as one full-width
    tile; large batches use 128-lane tiles so the grid stays >= 2 for v7x's
    two TensorCores once batch >= 256."""
    if batch < 2 * _LANE:
        bp = _round_up(batch, 8)
        return bp, bp
    bp = _round_up(batch, _LANE)
    return bp, _LANE


@jax.jit
def _forward(own, comm, wslab, aux):
    """own: (B, D), comm: (B, N, D) -> (B, D)."""
    own = own.astype(jnp.float32)
    comm = comm.astype(jnp.float32)
    B, D = own.shape
    N = comm.shape[1]

    Bp, tile = _tiling(B)
    pad = Bp - B
    if pad:                                   # static under jit
        own = jnp.pad(own, ((0, pad), (0, 0)))
        comm = jnp.pad(comm, ((0, pad), (0, 0), (0, 0)))

    own_t = own.T                             # (D, Bp): cheap plumbing, small operand

    out_t = pl.pallas_call(
        _comm_agg_kernel,
        out_shape=jax.ShapeDtypeStruct((D, Bp), jnp.float32),
        grid_spec=pltpu.PrefetchScalarGridSpec(
            num_scalar_prefetch=0,
            grid=(Bp // tile,),
            in_specs=[
                pl.BlockSpec((D, tile), lambda i: (0, i)),         # ownT, lane-tiled
                pl.BlockSpec((tile, N, D), lambda i: (i, 0, 0)),   # comm, native layout
                pl.BlockSpec((5 * D, D), lambda i: (0, 0)),        # weight slab (resident)
                pl.BlockSpec((D, 8), lambda i: (0, 0)),            # bias/LN slab (resident)
            ],
            out_specs=pl.BlockSpec((D, tile), lambda i: (0, i)),   # lane-dense output
        ),
        compiler_params=pltpu.CompilerParams(
            dimension_semantics=("parallel",)),
    )(own_t, comm, wslab, aux)
    return out_t.T[:B]


def init_params(key, d=LATENT_DIM):
    """Synthetic parameters matching nn.MultiheadAttention + LayerNorm shapes,
    plus kernel operands packed ONCE here (never per call)."""
    ks = jax.random.split(key, 5)
    lim = 1.0 / np.sqrt(d)
    wq = jax.random.uniform(ks[0], (d, d), jnp.float32, -lim, lim)
    wk = jax.random.uniform(ks[1], (d, d), jnp.float32, -lim, lim)
    wv = jax.random.uniform(ks[2], (d, d), jnp.float32, -lim, lim)
    wo = jax.random.uniform(ks[3], (d, d), jnp.float32, -lim, lim)
    biases = jax.random.uniform(ks[4], (4, d), jnp.float32, -lim, lim)
    gamma = jnp.ones((d,), jnp.float32)
    beta = jnp.zeros((d,), jnp.float32)

    params = {"wq": wq, "wk": wk, "wv": wv, "wo": wo,
              "bq": biases[0], "bk": biases[1], "bv": biases[2], "bo": biases[3],
              "gamma": gamma, "beta": beta}

    # (5D, D) weight slab, sublane-sliceable: [Wq/sqrt(hd); Wk; Wv; Wo; head mask].
    head = np.arange(d) // HEAD_DIM
    smask = jnp.asarray((head[:, None] == head[None, :]).astype(np.float32))
    scale = 1.0 / np.sqrt(HEAD_DIM)
    params["wslab"] = jnp.concatenate([wq * scale, wk, wv, wo, smask], axis=0)

    # (D, 8) aux slab: cols = [bq/sqrt(hd), bv, bo, gamma, beta, 0, 0, 0].
    # bk is intentionally absent (softmax is invariant to it; see kernel).
    aux = np.zeros((d, 8), np.float32)
    aux[:, 0] = np.asarray(biases[0]) * scale
    aux[:, 1] = np.asarray(biases[2])
    aux[:, 2] = np.asarray(biases[3])
    aux[:, 3] = np.asarray(gamma)
    aux[:, 4] = np.asarray(beta)
    params["aux"] = jnp.asarray(aux)
    return params


def communication_aggregator_batched(own_states, comm_vectors, params):
    """Batched API: own_states (B, D), comm_vectors (B, N, D) -> (B, D)."""
    return _forward(own_states, comm_vectors, params["wslab"], params["aux"])


def _reference_single(own_state, comm, params):
    """Pure-JAX reference reproducing PyTorch MultiheadAttention + LayerNorm."""
    d, h, hd = LATENT_DIM, NUM_HEADS, HEAD_DIM
    q = own_state @ params["wq"].T + params["bq"]
    k = comm @ params["wk"].T + params["bk"]
    v = comm @ params["wv"].T + params["bv"]
    qh = q.reshape(h, hd)
    kh = k.reshape(-1, h, hd)
    vh = v.reshape(-1, h, hd)
    scores = jnp.einsum("hd,nhd->nh", qh, kh) / np.sqrt(hd)
    attn = jax.nn.softmax(scores, axis=0)
    ctx = jnp.einsum("nh,nhd->hd", attn, vh).reshape(d)
    out = ctx @ params["wo"].T + params["bo"]
    y = out + own_state
    mean = jnp.mean(y)
    var = jnp.mean((y - mean) ** 2)
    return (y - mean) / jnp.sqrt(var + LN_EPS) * params["gamma"] + params["beta"]


_single_forward = jax.jit(_reference_single)


def communication_aggregator(own_state, comm_vectors, params):
    """Original module API: own_state (D,), comm_vectors list of (D,) -> (D,).
    At B=1 the pallas_call launch + DMA setup dwarfs the work, so this path
    stays in plain JAX (per perf review); the batched entry point uses Pallas."""
    if not comm_vectors:
        return jnp.zeros_like(own_state)
    comm = jnp.stack(comm_vectors, axis=0)
    return _single_forward(own_state, comm, params)


if __name__ == "__main__":
    key = jax.random.PRNGKey(0)
    k_own, k_comm, k_param = jax.random.split(key, 3)

    B, N, D = 16, 8, LATENT_DIM
    own_batch = jax.random.normal(k_own, (B, D), jnp.float32)
    comm_batch = jax.random.normal(k_comm, (B, N, D), jnp.float32)
    params = init_params(k_param)

    ref = jax.vmap(lambda o, c: _reference_single(o, c, params))(own_batch, comm_batch)

    # Batched Pallas path (single full-width lane tile at this size).
    out = jax.block_until_ready(
        communication_aggregator_batched(own_batch, comm_batch, params))
    np.testing.assert_allclose(np.asarray(out), np.asarray(ref), rtol=1e-4, atol=1e-4)

    # Ragged batch size (exercises the pad-to-sublane path).
    out5 = jax.block_until_ready(
        communication_aggregator_batched(own_batch[:5], comm_batch[:5], params))
    np.testing.assert_allclose(np.asarray(out5), np.asarray(ref[:5]), rtol=1e-4, atol=1e-4)

    # Multi-tile grid path (128-lane tiles, grid > 1, padded tail, v7x-friendly).
    Bl = 260
    own_l = jax.random.normal(k_own, (Bl, D), jnp.float32)
    comm_l = jax.random.normal(k_comm, (Bl, N, D), jnp.float32)
    out_l = jax.block_until_ready(
        communication_aggregator_batched(own_l, comm_l, params))
    ref_l = jax.vmap(lambda o, c: _reference_single(o, c, params))(own_l, comm_l)
    np.testing.assert_allclose(np.asarray(out_l), np.asarray(ref_l), rtol=1e-4, atol=1e-4)

    # Original single-token module API (plain-JAX fast path) + empty-message branch.
    single = jax.block_until_ready(
        communication_aggregator(own_batch[0],
                                 [comm_batch[0, i] for i in range(N)], params))
    np.testing.assert_allclose(np.asarray(single), np.asarray(ref[0]), rtol=1e-4, atol=1e-4)
    empty = communication_aggregator(own_batch[0], [], params)
    assert np.allclose(np.asarray(empty), 0.0)

    print("KERNEL_OK")
</pallas_src>

<mosaic_0001>
module attributes {stable_mosaic.version = 11 : i64} {
  func.func @_comm_agg_kernel(%arg0: i32, %arg1: memref<32x16xf32, #tpu.memory_space<vmem>>, %arg2: memref<16x8x32xf32, #tpu.memory_space<vmem>>, %arg3: memref<160x32xf32, #tpu.memory_space<vmem>>, %arg4: memref<32x8xf32, #tpu.memory_space<vmem>>, %arg5: memref<32x16xf32, #tpu.memory_space<vmem>>) attributes {dimension_semantics = [#tpu.dimension_semantics<parallel>], iteration_bounds = array<i64: 1>, scalar_prefetch = 0 : i64, scratch_operands = 0 : i64, tpu.core_type = #tpu.core_type<tc>, window_params = [{transform_indices = @transform_0, window_bounds = array<i64: 32, 16>}, {transform_indices = @transform_1, window_bounds = array<i64: 16, 8, 32>}, {pipeline_mode = #tpu.pipeline_mode<synchronous>, transform_indices = @transform_2, window_bounds = array<i64: 160, 32>}, {pipeline_mode = #tpu.pipeline_mode<synchronous>, transform_indices = @transform_3, window_bounds = array<i64: 32, 8>}, {transform_indices = @transform_4, window_bounds = array<i64: 32, 16>}]} {
    %c0 = arith.constant 0 : index
    %c0_0 = arith.constant 0 : index
    %0 = vector.load %arg3[%c0, %c0_0] : memref<160x32xf32, #tpu.memory_space<vmem>>, vector<160x32xf32>
    %1 = vector.extract_strided_slice %0 {offsets = [0, 0], sizes = [32, 32], strides = [1, 1]} : vector<160x32xf32> to vector<32x32xf32>
    %2 = vector.extract_strided_slice %0 {offsets = [32, 0], sizes = [64, 32], strides = [1, 1]} : vector<160x32xf32> to vector<64x32xf32>
    %3 = vector.extract_strided_slice %0 {offsets = [96, 0], sizes = [32, 32], strides = [1, 1]} : vector<160x32xf32> to vector<32x32xf32>
    %4 = vector.extract_strided_slice %0 {offsets = [128, 0], sizes = [32, 32], strides = [1, 1]} : vector<160x32xf32> to vector<32x32xf32>
    %c0_1 = arith.constant 0 : index
    %c0_2 = arith.constant 0 : index
    %5 = vector.load %arg4[%c0_1, %c0_2] : memref<32x8xf32, #tpu.memory_space<vmem>>, vector<32x1xf32>
    %c0_3 = arith.constant 0 : index
    %c1 = arith.constant 1 : index
    %6 = vector.load %arg4[%c0_3, %c1] : memref<32x8xf32, #tpu.memory_space<vmem>>, vector<32x1xf32>
    %c0_4 = arith.constant 0 : index
    %c2 = arith.constant 2 : index
    %7 = vector.load %arg4[%c0_4, %c2] : memref<32x8xf32, #tpu.memory_space<vmem>>, vector<32x1xf32>
    %c0_5 = arith.constant 0 : index
    %c3 = arith.constant 3 : index
    %8 = vector.load %arg4[%c0_5, %c3] : memref<32x8xf32, #tpu.memory_space<vmem>>, vector<32x1xf32>
    %c0_6 = arith.constant 0 : index
    %c4 = arith.constant 4 : index
    %9 = vector.load %arg4[%c0_6, %c4] : memref<32x8xf32, #tpu.memory_space<vmem>>, vector<32x1xf32>
    %c0_7 = arith.constant 0 : index
    %c0_8 = arith.constant 0 : index
    %10 = vector.load %arg1[%c0_7, %c0_8] : memref<32x16xf32, #tpu.memory_space<vmem>>, vector<32x16xf32>
    %cst = arith.constant dense<0.000000e+00> : vector<32x16xf32>
    %11 = tpu.matmul %1, %10, %cst {dimension_numbers = #tpu.dot_dimension_numbers<[1], [0], [0], [1], [0, 0, 1, 1], [], []>} : vector<32x32xf32>, vector<32x16xf32>, vector<32x16xf32> -> vector<32x16xf32>
    %12 = vector.broadcast %5 : vector<32x1xf32> to vector<32x16xf32>
    %13 = arith.addf %11, %12 : vector<32x16xf32>
    %c0_9 = arith.constant 0 : index
    %c0_10 = arith.constant 0 : index
    %c0_11 = arith.constant 0 : index
    %14 = vector.load %arg2[%c0_9, %c0_10, %c0_11] : memref<16x8x32xf32, #tpu.memory_space<vmem>>, vector<16x1x32xf32>
    %15 = vector.shape_cast %14 : vector<16x1x32xf32> to vector<16x32xf32>
    %16 = tpu.transpose %15, [1, 0] : vector<16x32xf32> -> vector<32x16xf32>
    %cst_12 = arith.constant dense<0.000000e+00> : vector<64x16xf32>
    %17 = tpu.matmul %2, %16, %cst_12 {dimension_numbers = #tpu.dot_dimension_numbers<[1], [0], [0], [1], [0, 0, 1, 1], [], []>} : vector<64x32xf32>, vector<32x16xf32>, vector<64x16xf32> -> vector<64x16xf32>
    %18 = vector.extract_strided_slice %17 {offsets = [0, 0], sizes = [32, 16], strides = [1, 1]} : vector<64x16xf32> to vector<32x16xf32>
    %19 = vector.extract_strided_slice %17 {offsets = [32, 0], sizes = [32, 16], strides = [1, 1]} : vector<64x16xf32> to vector<32x16xf32>
    %20 = arith.mulf %13, %18 : vector<32x16xf32>
    %cst_13 = arith.constant dense<0.000000e+00> : vector<32x16xf32>
    %21 = tpu.matmul %4, %20, %cst_13 {dimension_numbers = #tpu.dot_dimension_numbers<[1], [0], [0], [1], [0, 0, 1, 1], [], []>} : vector<32x32xf32>, vector<32x16xf32>, vector<32x16xf32> -> vector<32x16xf32>
    %cst_14 = arith.constant 1.000000e+00 : f32
    %22 = vector.broadcast %cst_14 : f32 to vector<32x16xf32>
    %c0_15 = arith.constant 0 : index
    %c1_16 = arith.constant 1 : index
    %c0_17 = arith.constant 0 : index
    %23 = vector.load %arg2[%c0_15, %c1_16, %c0_17] : memref<16x8x32xf32, #tpu.memory_space<vmem>>, vector<16x1x32xf32>
    %24 = vector.shape_cast %23 : vector<16x1x32xf32> to vector<16x32xf32>
    %25 = tpu.transpose %24, [1, 0] : vector<16x32xf32> -> vector<32x16xf32>
    %cst_18 = arith.constant dense<0.000000e+00> : vector<64x16xf32>
    %26 = tpu.matmul %2, %25, %cst_18 {dimension_numbers = #tpu.dot_dimension_numbers<[1], [0], [0], [1], [0, 0, 1, 1], [], []>} : vector<64x32xf32>, vector<32x16xf32>, vector<64x16xf32> -> vector<64x16xf32>
    %27 = vector.extract_strided_slice %26 {offsets = [0, 0], sizes = [32, 16], strides = [1, 1]} : vector<64x16xf32> to vector<32x16xf32>
    %28 = vector.extract_strided_slice %26 {offsets = [32, 0], sizes = [32, 16], strides = [1, 1]} : vector<64x16xf32> to vector<32x16xf32>
    %29 = arith.mulf %13, %27 : vector<32x16xf32>
    %cst_19 = arith.constant dense<0.000000e+00> : vector<32x16xf32>
    %30 = tpu.matmul %4, %29, %cst_19 {dimension_numbers = #tpu.dot_dimension_numbers<[1], [0], [0], [1], [0, 0, 1, 1], [], []>} : vector<32x32xf32>, vector<32x16xf32>, vector<32x16xf32> -> vector<32x16xf32>
    %31 = arith.maximumf %21, %30 : vector<32x16xf32>
    %32 = arith.subf %21, %31 : vector<32x16xf32>
    %33 = math.exp %32 : vector<32x16xf32>
    %34 = arith.subf %30, %31 : vector<32x16xf32>
    %35 = math.exp %34 : vector<32x16xf32>
    %36 = arith.mulf %33, %22 : vector<32x16xf32>
    %37 = arith.addf %36, %35 : vector<32x16xf32>
    %38 = arith.mulf %33, %19 : vector<32x16xf32>
    %39 = arith.mulf %35, %28 : vector<32x16xf32>
    %40 = arith.addf %38, %39 : vector<32x16xf32>
    %c0_20 = arith.constant 0 : index
    %c2_21 = arith.constant 2 : index
    %c0_22 = arith.constant 0 : index
    %41 = vector.load %arg2[%c0_20, %c2_21, %c0_22] : memref<16x8x32xf32, #tpu.memory_space<vmem>>, vector<16x1x32xf32>
    %42 = vector.shape_cast %41 : vector<16x1x32xf32> to vector<16x32xf32>
    %43 = tpu.transpose %42, [1, 0] : vector<16x32xf32> -> vector<32x16xf32>
    %cst_23 = arith.constant dense<0.000000e+00> : vector<64x16xf32>
    %44 = tpu.matmul %2, %43, %cst_23 {dimension_numbers = #tpu.dot_dimension_numbers<[1], [0], [0], [1], [0, 0, 1, 1], [], []>} : vector<64x32xf32>, vector<32x16xf32>, vector<64x16xf32> -> vector<64x16xf32>
    %45 = vector.extract_strided_slice %44 {offsets = [0, 0], sizes = [32, 16], strides = [1, 1]} : vector<64x16xf32> to vector<32x16xf32>
    %46 = vector.extract_strided_slice %44 {offsets = [32, 0], sizes = [32, 16], strides = [1, 1]} : vector<64x16xf32> to vector<32x16xf32>
    %47 = arith.mulf %13, %45 : vector<32x16xf32>
    %cst_24 = arith.constant dense<0.000000e+00> : vector<32x16xf32>
    %48 = tpu.matmul %4, %47, %cst_24 {dimension_numbers = #tpu.dot_dimension_numbers<[1], [0], [0], [1], [0, 0, 1, 1], [], []>} : vector<32x32xf32>, vector<32x16xf32>, vector<32x16xf32> -> vector<32x16xf32>
    %49 = arith.maximumf %31, %48 : vector<32x16xf32>
    %50 = arith.subf %31, %49 : vector<32x16xf32>
    %51 = math.exp %50 : vector<32x16xf32>
    %52 = arith.subf %48, %49 : vector<32x16xf32>
    %53 = math.exp %52 : vector<32x16xf32>
    %54 = arith.mulf %51, %37 : vector<32x16xf32>
    %55 = arith.addf %54, %53 : vector<32x16xf32>
    %56 = arith.mulf %51, %40 : vector<32x16xf32>
    %57 = arith.mulf %53, %46 : vector<32x16xf32>
    %58 = arith.addf %56, %57 : vector<32x16xf32>
    %c0_25 = arith.constant 0 : index
    %c3_26 = arith.constant 3 : index
    %c0_27 = arith.constant 0 : index
    %59 = vector.load %arg2[%c0_25, %c3_26, %c0_27] : memref<16x8x32xf32, #tpu.memory_space<vmem>>, vector<16x1x32xf32>
    %60 = vector.shape_cast %59 : vector<16x1x32xf32> to vector<16x32xf32>
    %61 = tpu.transpose %60, [1, 0] : vector<16x32xf32> -> vector<32x16xf32>
    %cst_28 = arith.constant dense<0.000000e+00> : vector<64x16xf32>
    %62 = tpu.matmul %2, %61, %cst_28 {dimension_numbers = #tpu.dot_dimension_numbers<[1], [0], [0], [1], [0, 0, 1, 1], [], []>} : vector<64x32xf32>, vector<32x16xf32>, vector<64x16xf32> -> vector<64x16xf32>
    %63 = vector.extract_strided_slice %62 {offsets = [0, 0], sizes = [32, 16], strides = [1, 1]} : vector<64x16xf32> to vector<32x16xf32>
    %64 = vector.extract_strided_slice %62 {offsets = [32, 0], sizes = [32, 16], strides = [1, 1]} : vector<64x16xf32> to vector<32x16xf32>
    %65 = arith.mulf %13, %63 : vector<32x16xf32>
    %cst_29 = arith.constant dense<0.000000e+00> : vector<32x16xf32>
    %66 = tpu.matmul %4, %65, %cst_29 {dimension_numbers = #tpu.dot_dimension_numbers<[1], [0], [0], [1], [0, 0, 1, 1], [], []>} : vector<32x32xf32>, vector<32x16xf32>, vector<32x16xf32> -> vector<32x16xf32>
    %67 = arith.maximumf %49, %66 : vector<32x16xf32>
    %68 = arith.subf %49, %67 : vector<32x16xf32>
    %69 = math.exp %68 : vector<32x16xf32>
    %70 = arith.subf %66, %67 : vector<32x16xf32>
    %71 = math.exp %70 : vector<32x16xf32>
    %72 = arith.mulf %69, %55 : vector<32x16xf32>
    %73 = arith.addf %72, %71 : vector<32x16xf32>
    %74 = arith.mulf %69, %58 : vector<32x16xf32>
    %75 = arith.mulf %71, %64 : vector<32x16xf32>
    %76 = arith.addf %74, %75 : vector<32x16xf32>
    %c0_30 = arith.constant 0 : index
    %c4_31 = arith.constant 4 : index
    %c0_32 = arith.constant 0 : index
    %77 = vector.load %arg2[%c0_30, %c4_31, %c0_32] : memref<16x8x32xf32, #tpu.memory_space<vmem>>, vector<16x1x32xf32>
    %78 = vector.shape_cast %77 : vector<16x1x32xf32> to vector<16x32xf32>
    %79 = tpu.transpose %78, [1, 0] : vector<16x32xf32> -> vector<32x16xf32>
    %cst_33 = arith.constant dense<0.000000e+00> : vector<64x16xf32>
    %80 = tpu.matmul %2, %79, %cst_33 {dimension_numbers = #tpu.dot_dimension_numbers<[1], [0], [0], [1], [0, 0, 1, 1], [], []>} : vector<64x32xf32>, vector<32x16xf32>, vector<64x16xf32> -> vector<64x16xf32>
    %81 = vector.extract_strided_slice %80 {offsets = [0, 0], sizes = [32, 16], strides = [1, 1]} : vector<64x16xf32> to vector<32x16xf32>
    %82 = vector.extract_strided_slice %80 {offsets = [32, 0], sizes = [32, 16], strides = [1, 1]} : vector<64x16xf32> to vector<32x16xf32>
    %83 = arith.mulf %13, %81 : vector<32x16xf32>
    %cst_34 = arith.constant dense<0.000000e+00> : vector<32x16xf32>
    %84 = tpu.matmul %4, %83, %cst_34 {dimension_numbers = #tpu.dot_dimension_numbers<[1], [0], [0], [1], [0, 0, 1, 1], [], []>} : vector<32x32xf32>, vector<32x16xf32>, vector<32x16xf32> -> vector<32x16xf32>
    %85 = arith.maximumf %67, %84 : vector<32x16xf32>
    %86 = arith.subf %67, %85 : vector<32x16xf32>
    %87 = math.exp %86 : vector<32x16xf32>
    %88 = arith.subf %84, %85 : vector<32x16xf32>
    %89 = math.exp %88 : vector<32x16xf32>
    %90 = arith.mulf %87, %73 : vector<32x16xf32>
    %91 = arith.addf %90, %89 : vector<32x16xf32>
    %92 = arith.mulf %87, %76 : vector<32x16xf32>
    %93 = arith.mulf %89, %82 : vector<32x16xf32>
    %94 = arith.addf %92, %93 : vector<32x16xf32>
    %c0_35 = arith.constant 0 : index
    %c5 = arith.constant 5 : index
    %c0_36 = arith.constant 0 : index
    %95 = vector.load %arg2[%c0_35, %c5, %c0_36] : memref<16x8x32xf32, #tpu.memory_space<vmem>>, vector<16x1x32xf32>
    %96 = vector.shape_cast %95 : vector<16x1x32xf32> to vector<16x32xf32>
    %97 = tpu.transpose %96, [1, 0] : vector<16x32xf32> -> vector<32x16xf32>
    %cst_37 = arith.constant dense<0.000000e+00> : vector<64x16xf32>
    %98 = tpu.matmul %2, %97, %cst_37 {dimension_numbers = #tpu.dot_dimension_numbers<[1], [0], [0], [1], [0, 0, 1, 1], [], []>} : vector<64x32xf32>, vector<32x16xf32>, vector<64x16xf32> -> vector<64x16xf32>
    %99 = vector.extract_strided_slice %98 {offsets = [0, 0], sizes = [32, 16], strides = [1, 1]} : vector<64x16xf32> to vector<32x16xf32>
    %100 = vector.extract_strided_slice %98 {offsets = [32, 0], sizes = [32, 16], strides = [1, 1]} : vector<64x16xf32> to vector<32x16xf32>
    %101 = arith.mulf %13, %99 : vector<32x16xf32>
    %cst_38 = arith.constant dense<0.000000e+00> : vector<32x16xf32>
    %102 = tpu.matmul %4, %101, %cst_38 {dimension_numbers = #tpu.dot_dimension_numbers<[1], [0], [0], [1], [0, 0, 1, 1], [], []>} : vector<32x32xf32>, vector<32x16xf32>, vector<32x16xf32> -> vector<32x16xf32>
    %103 = arith.maximumf %85, %102 : vector<32x16xf32>
    %104 = arith.subf %85, %103 : vector<32x16xf32>
    %105 = math.exp %104 : vector<32x16xf32>
    %106 = arith.subf %102, %103 : vector<32x16xf32>
    %107 = math.exp %106 : vector<32x16xf32>
    %108 = arith.mulf %105, %91 : vector<32x16xf32>
    %109 = arith.addf %108, %107 : vector<32x16xf32>
    %110 = arith.mulf %105, %94 : vector<32x16xf32>
    %111 = arith.mulf %107, %100 : vector<32x16xf32>
    %112 = arith.addf %110, %111 : vector<32x16xf32>
    %c0_39 = arith.constant 0 : index
    %c6 = arith.constant 6 : index
    %c0_40 = arith.constant 0 : index
    %113 = vector.load %arg2[%c0_39, %c6, %c0_40] : memref<16x8x32xf32, #tpu.memory_space<vmem>>, vector<16x1x32xf32>
    %114 = vector.shape_cast %113 : vector<16x1x32xf32> to vector<16x32xf32>
    %115 = tpu.transpose %114, [1, 0] : vector<16x32xf32> -> vector<32x16xf32>
    %cst_41 = arith.constant dense<0.000000e+00> : vector<64x16xf32>
    %116 = tpu.matmul %2, %115, %cst_41 {dimension_numbers = #tpu.dot_dimension_numbers<[1], [0], [0], [1], [0, 0, 1, 1], [], []>} : vector<64x32xf32>, vector<32x16xf32>, vector<64x16xf32> -> vector<64x16xf32>
    %117 = vector.extract_strided_slice %116 {offsets = [0, 0], sizes = [32, 16], strides = [1, 1]} : vector<64x16xf32> to vector<32x16xf32>
    %118 = vector.extract_strided_slice %116 {offsets = [32, 0], sizes = [32, 16], strides = [1, 1]} : vector<64x16xf32> to vector<32x16xf32>
    %119 = arith.mulf %13, %117 : vector<32x16xf32>
    %cst_42 = arith.constant dense<0.000000e+00> : vector<32x16xf32>
    %120 = tpu.matmul %4, %119, %cst_42 {dimension_numbers = #tpu.dot_dimension_numbers<[1], [0], [0], [1], [0, 0, 1, 1], [], []>} : vector<32x32xf32>, vector<32x16xf32>, vector<32x16xf32> -> vector<32x16xf32>
    %121 = arith.maximumf %103, %120 : vector<32x16xf32>
    %122 = arith.subf %103, %121 : vector<32x16xf32>
    %123 = math.exp %122 : vector<32x16xf32>
    %124 = arith.subf %120, %121 : vector<32x16xf32>
    %125 = math.exp %124 : vector<32x16xf32>
    %126 = arith.mulf %123, %109 : vector<32x16xf32>
    %127 = arith.addf %126, %125 : vector<32x16xf32>
    %128 = arith.mulf %123, %112 : vector<32x16xf32>
    %129 = arith.mulf %125, %118 : vector<32x16xf32>
    %130 = arith.addf %128, %129 : vector<32x16xf32>
    %c0_43 = arith.constant 0 : index
    %c7 = arith.constant 7 : index
    %c0_44 = arith.constant 0 : index
    %131 = vector.load %arg2[%c0_43, %c7, %c0_44] : memref<16x8x32xf32, #tpu.memory_space<vmem>>, vector<16x1x32xf32>
    %132 = vector.shape_cast %131 : vector<16x1x32xf32> to vector<16x32xf32>
    %133 = tpu.transpose %132, [1, 0] : vector<16x32xf32> -> vector<32x16xf32>
    %cst_45 = arith.constant dense<0.000000e+00> : vector<64x16xf32>
    %134 = tpu.matmul %2, %133, %cst_45 {dimension_numbers = #tpu.dot_dimension_numbers<[1], [0], [0], [1], [0, 0, 1, 1], [], []>} : vector<64x32xf32>, vector<32x16xf32>, vector<64x16xf32> -> vector<64x16xf32>
    %135 = vector.extract_strided_slice %134 {offsets = [0, 0], sizes = [32, 16], strides = [1, 1]} : vector<64x16xf32> to vector<32x16xf32>
    %136 = vector.extract_strided_slice %134 {offsets = [32, 0], sizes = [32, 16], strides = [1, 1]} : vector<64x16xf32> to vector<32x16xf32>
    %137 = arith.mulf %13, %135 : vector<32x16xf32>
    %cst_46 = arith.constant dense<0.000000e+00> : vector<32x16xf32>
    %138 = tpu.matmul %4, %137, %cst_46 {dimension_numbers = #tpu.dot_dimension_numbers<[1], [0], [0], [1], [0, 0, 1, 1], [], []>} : vector<32x32xf32>, vector<32x16xf32>, vector<32x16xf32> -> vector<32x16xf32>
    %139 = arith.maximumf %121, %138 : vector<32x16xf32>
    %140 = arith.subf %121, %139 : vector<32x16xf32>
    %141 = math.exp %140 : vector<32x16xf32>
    %142 = arith.subf %138, %139 : vector<32x16xf32>
    %143 = math.exp %142 : vector<32x16xf32>
    %144 = arith.mulf %141, %127 : vector<32x16xf32>
    %145 = arith.addf %144, %143 : vector<32x16xf32>
    %146 = arith.mulf %141, %130 : vector<32x16xf32>
    %147 = arith.mulf %143, %136 : vector<32x16xf32>
    %148 = arith.addf %146, %147 : vector<32x16xf32>
    %149 = tpu.reciprocal %145 {approx = true} : vector<32x16xf32> -> vector<32x16xf32>
    %150 = arith.mulf %145, %149 : vector<32x16xf32>
    %cst_47 = arith.constant 2.000000e+00 : f32
    %151 = vector.broadcast %cst_47 : f32 to vector<32x16xf32>
    %152 = arith.subf %151, %150 : vector<32x16xf32>
    %153 = arith.mulf %149, %152 : vector<32x16xf32>
    %154 = arith.mulf %148, %153 : vector<32x16xf32>
    %155 = vector.broadcast %6 : vector<32x1xf32> to vector<32x16xf32>
    %156 = arith.addf %154, %155 : vector<32x16xf32>
    %cst_48 = arith.constant dense<0.000000e+00> : vector<32x16xf32>
    %157 = tpu.matmul %3, %156, %cst_48 {dimension_numbers = #tpu.dot_dimension_numbers<[1], [0], [0], [1], [0, 0, 1, 1], [], []>} : vector<32x32xf32>, vector<32x16xf32>, vector<32x16xf32> -> vector<32x16xf32>
    %158 = vector.broadcast %7 : vector<32x1xf32> to vector<32x16xf32>
    %159 = arith.addf %157, %158 : vector<32x16xf32>
    %160 = arith.addf %159, %10 : vector<32x16xf32>
    %cst_49 = arith.constant dense<0.000000e+00> : vector<16xf32>
    %161 = vector.multi_reduction <add>, %160, %cst_49 [0] : vector<32x16xf32> to vector<16xf32>
    %162 = vector.shape_cast %161 : vector<16xf32> to vector<1x16xf32>
    %cst_50 = arith.constant 3.200000e+01 : f32
    %163 = vector.broadcast %cst_50 : f32 to vector<1x16xf32>
    %164 = arith.divf %162, %163 : vector<1x16xf32>
    %165 = vector.broadcast %164 : vector<1x16xf32> to vector<32x16xf32>
    %166 = arith.subf %160, %165 : vector<32x16xf32>
    %167 = arith.mulf %166, %166 : vector<32x16xf32>
    %cst_51 = arith.constant dense<0.000000e+00> : vector<16xf32>
    %168 = vector.multi_reduction <add>, %167, %cst_51 [0] : vector<32x16xf32> to vector<16xf32>
    %169 = vector.shape_cast %168 : vector<16xf32> to vector<1x16xf32>
    %cst_52 = arith.constant 3.200000e+01 : f32
    %170 = vector.broadcast %cst_52 : f32 to vector<1x16xf32>
    %171 = arith.divf %169, %170 : vector<1x16xf32>
    %172 = vector.broadcast %164 : vector<1x16xf32> to vector<32x16xf32>
    %173 = arith.subf %160, %172 : vector<32x16xf32>
    %cst_53 = arith.constant 9.99999974E-6 : f32
    %174 = vector.broadcast %cst_53 : f32 to vector<1x16xf32>
    %175 = arith.addf %171, %174 : vector<1x16xf32>
    %176 = math.rsqrt %175 : vector<1x16xf32>
    %177 = vector.broadcast %176 : vector<1x16xf32> to vector<32x16xf32>
    %178 = arith.mulf %173, %177 : vector<32x16xf32>
    %179 = vector.broadcast %8 : vector<32x1xf32> to vector<32x16xf32>
    %180 = arith.mulf %178, %179 : vector<32x16xf32>
    %181 = vector.broadcast %9 : vector<32x1xf32> to vector<32x16xf32>
    %182 = arith.addf %180, %181 : vector<32x16xf32>
    %c0_54 = arith.constant 0 : index
    %c0_55 = arith.constant 0 : index
    %183 = vector.load %arg5[%c0_54, %c0_55] : memref<32x16xf32, #tpu.memory_space<vmem>>, vector<32x16xf32>
    tpu.vector_store %arg5[%c0_54, %c0_55], %182 {strides = array<i32>} : memref<32x16xf32, #tpu.memory_space<vmem>>, vector<32x16xf32>,
    return
  }
  func.func @transform_0(%arg0: i32) -> (i32, i32) {
    %c0_i32 = arith.constant 0 : i32
    %c0_i32_0 = arith.constant 0 : i32
    return %c0_i32, %arg0 : i32, i32
  }
  func.func @transform_1(%arg0: i32) -> (i32, i32, i32) {
    %c0_i32 = arith.constant 0 : i32
    %c0_i32_0 = arith.constant 0 : i32
    %c0_i32_1 = arith.constant 0 : i32
    return %arg0, %c0_i32, %c0_i32_0 : i32, i32, i32
  }
  func.func @transform_2(%arg0: i32) -> (i32, i32) {
    %c0_i32 = arith.constant 0 : i32
    %c0_i32_0 = arith.constant 0 : i32
    %c0_i32_1 = arith.constant 0 : i32
    return %c0_i32, %c0_i32_0 : i32, i32
  }
  func.func @transform_3(%arg0: i32) -> (i32, i32) {
    %c0_i32 = arith.constant 0 : i32
    %c0_i32_0 = arith.constant 0 : i32
    %c0_i32_1 = arith.constant 0 : i32
    return %c0_i32, %c0_i32_0 : i32, i32
  }
  func.func @transform_4(%arg0: i32) -> (i32, i32) {
    %c0_i32 = arith.constant 0 : i32
    %c0_i32_0 = arith.constant 0 : i32
    return %c0_i32, %arg0 : i32, i32
  }
}

</mosaic_0001>

<bundles_post_ra>
// kernel: _forward.1
= control target key start
LH: loop header
LB: loop body
LE: loop exit
PB: predicated region body
PF: predicated region fallthrough
CT: control target
= control target key end

     0   :  { %vm65_vm0 = vcmask 261120   ;;  %vm140_vm1 = vcmask 1041409   ;;  %vm143_vm2 = vcmask 1042434   ;;  %vm146_vm3 = vcmask 1043459   ;;  %s3286_s0 = inlined_call_operand.vmem [shape: f32[32,16], index: 0, kind: input, shape index: {}]   ;;  %s3287_s1 = inlined_call_operand.vmem [shape: f32[16,8,32], index: 1, kind: input, shape index: {}]   ;;  %s3288_s2 = inlined_call_operand.vmem [shape: f32[160,32], index: 2, kind: input, shape index: {}]   ;;  %s3289_s3 = inlined_call_operand.vmem [shape: f32[32,8], index: 3, kind: input, shape index: {}]   ;;  %s3290_s4 = inlined_call_operand.vmem [shape: f32[32,16], index: 4, kind: output, shape index: {}]  }
   0x1   :  { %v44_v0 = vld [vmem:[%s3286_s0 + $0x18] sm:$0xff]  ;;  %v43_v1 = vld [vmem:[%s3286_s0 + $0x10] sm:$0xff]  ;;  %v115_v2 = vld [vmem:[%s3287_s1 + $0x40] sm:$0x1]  ;;  %vm149_vm4 = vcmask 1044484   ;;  %vm152_vm5 = vcmask 1045509  }
   0x2   :  { %90 = vmatpush.msra.mxu0 %v44_v0  ;;  %v116_v3 = vld [vmem:[%s3287_s1 + $0x48] sm:$0x1]  ;;  %v117_v4 = vld [vmem:[%s3287_s1 + $0x50] sm:$0x1]  ;;  %v118_v5 = vld [vmem:[%s3287_s1 + $0x58] sm:$0x1]  ;;  %1914 = vmatpush.msra.mxu2 %v44_v0 }
   0x3   :  { %v119_v6 = vld [vmem:[%s3287_s1 + $0x60] sm:$0x1]  ;;  %v120_v7 = vld [vmem:[%s3287_s1 + $0x68] sm:$0x1]  ;;  %v121_v8 = vld [vmem:[%s3287_s1 + $0x70] sm:$0x1] }
   0x4   :  { %91 = vmatpush.msra.mxu0 %v43_v1  ;;  %v122_v9 = vld [vmem:[%s3287_s1 + $0x78] sm:$0x1]  ;;  %vm155_vm6 = vcmask 1046534   ;;  %vm158_vm7 = vcmask 1047559   ;;  %v160_v10 = vrot.slane %v116_v3, 7  ;;  %v162_v11 = vrot.slane %v117_v4, 6  ;;  %1915 = vmatpush.msra.mxu2 %v43_v1 }
   0x5   :  { %v164_v12 = vrot.slane %v118_v5, 5  ;;  %v166_v13 = vrot.slane %v119_v6, 4  ;;  %v168_v14 = vrot.slane %v120_v7, 3  ;;  %v170_v15 = vrot.slane %v121_v8, 2  ;;  %v42_v16 = vld [vmem:[%s3286_s0 + $0x8] sm:$0xff]  ;;  %v41_v17 = vld [vmem:[%s3286_s0] sm:$0xff] }
   0x6   :  { %v161_v18 = vsel %vm140_vm1, %v160_v10, %v115_v2  ;;  %v172_v19 = vrot.slane %v122_v9, 1  ;;  %92 = vmatpush.msra.mxu0 %v42_v16  ;;  %v107_v20 = vld [vmem:[%s3287_s1] sm:$0x1]  ;;  %v108_v21 = vld [vmem:[%s3287_s1 + $0x8] sm:$0x1]  ;;  %1916 = vmatpush.msra.mxu2 %v42_v16  ;;  %v19_v39 = vld [vmem:[%s3288_s2 + $0x10] sm:$0xff] }
   0x7   :  { %v17_v22 = vld [vmem:[%s3288_s2] sm:$0xff]  ;;  %v163_v23 = vsel %vm143_vm2, %v162_v11, %v161_v18  ;;  %v109_v24 = vld [vmem:[%s3287_s1 + $0x10] sm:$0x1]  ;;  %v110_v25 = vld [vmem:[%s3287_s1 + $0x18] sm:$0x1]  ;;  %v139_v32 = vrot.slane %v108_v21, 7 }
   0x8   :  { %v111_v26 = vld [vmem:[%s3287_s1 + $0x20] sm:$0x1]  ;;  %v165_v27 = vsel %vm146_vm3, %v164_v12, %v163_v23  ;;  %93 = vmatpush.msra.mxu0 %v41_v17  ;;  %v112_v28 = vld [vmem:[%s3287_s1 + $0x28] sm:$0x1]  ;;  %v113_v29 = vld [vmem:[%s3287_s1 + $0x30] sm:$0x1]  ;;  %1917 = vmatpush.msra.mxu2 %v41_v17 }
   0x9   :  { %v114_v30 = vld [vmem:[%s3287_s1 + $0x38] sm:$0x1]  ;;  %v167_v31 = vsel %vm149_vm4, %v166_v13, %v165_v27  ;;  %v142_v33 = vrot.slane %v109_v24, 6  ;;  %v145_v34 = vrot.slane %v110_v25, 5  ;;  %1794 = vmatmul.msk.f32.vlgmr.msra.gmra.mxu0 %vm65_vm0, %v17_v22  ;;  %v148_v36 = vrot.slane %v111_v26, 4  ;;  %v38_v43 = vld [vmem:[%s3289_s3 + $0x8] sm:$0xff]  ;;  %1796 = vmatmul.msk.f32.vlgmr.msra.gmra.mxu2 %vm65_vm0, %v19_v39 }
   0xa   :  { %v169_v35 = vsel %vm152_vm5, %v168_v14, %v167_v31  ;;  %v151_v37 = vrot.slane %v112_v28, 3  ;;  %v154_v38 = vrot.slane %v113_v29, 2  ;;  %v141_v41 = vsel %vm140_vm1, %v139_v32, %v107_v20  ;;  %v296_v44 = vld [vmem:[%s3287_s1 + $0x41] sm:$0x1]  ;;  %v297_v48 = vld [vmem:[%s3287_s1 + $0x49] sm:$0x1] }
   0xb   :  { %v171_v40 = vsel %vm155_vm6, %v170_v15, %v169_v35  ;;  %v157_v42 = vrot.slane %v114_v30, 1  ;;  %v144_v46 = vsel %vm143_vm2, %v142_v33, %v141_v41  ;;  %v2083_v47 = vmov 0   ;;  %v298_v49 = vld [vmem:[%s3287_s1 + $0x51] sm:$0x1]  ;;  %v299_v50 = vld [vmem:[%s3287_s1 + $0x59] sm:$0x1] }
   0xc   :  { %v173_v45 = vsel %vm158_vm7, %v172_v19, %v171_v40  ;;  %1927 = vset.pattern.permute.xlu1 %v2083_v47  ;;  %1926 = vset.pattern.permute.xlu0 %v2083_v47  ;;  %v147_v51 = vsel %vm146_vm3, %v145_v34, %v144_v46  ;;  %v300_v52 = vld [vmem:[%s3287_s1 + $0x61] sm:$0x1]  ;;  %v301_v53 = vld [vmem:[%s3287_s1 + $0x69] sm:$0x1]  ;;  %v302_v54 = vld [vmem:[%s3287_s1 + $0x71] sm:$0x1] }
   0xd   :  { %1798 = vmatpush.xpose.msk.msra.mxu1 %vm65_vm0, %v173_v45  ;;  %1918 = vmatpush.xpose.msk.msra.mxu3 %vm65_vm0, %v173_v45  ;;  %v150_v55 = vsel %vm149_vm4, %v148_v36, %v147_v51  ;;  %v18_v56 = vld [vmem:[%s3288_s2 + $0x8] sm:$0xff]  ;;  %v303_v57 = vld [vmem:[%s3287_s1 + $0x79] sm:$0x1]  ;;  %v334_v58 = vrot.slane %v297_v48, 7  ;;  %v336_v59 = vrot.slane %v298_v49, 6  ;;  %v338_v60 = vrot.slane %v299_v50, 5 }
   0xe   :  { %52 = vperm.xlu1 %1927, %v38_v43   ;;  %v153_v61 = vsel %vm152_vm5, %v151_v37, %v150_v55  ;;  %v340_v62 = vrot.slane %v300_v52, 4  ;;  %v342_v63 = vrot.slane %v301_v53, 3  ;;  %v20_v0 = vld [vmem:[%s3288_s2 + $0x18] sm:$0xff]  ;;  %v288_v1 = vld [vmem:[%s3287_s1 + $0x1] sm:$0x1]  ;;  %v344_v5 = vrot.slane %v302_v54, 2 }
   0xf   :  { %v156_v2 = vsel %vm155_vm6, %v154_v38, %v153_v61  ;;  %v2236_v3 = vld [vmem:[%s3288_s2 + $0x20] sm:$0xff]  ;;  %v335_v4 = vsel %vm140_vm1, %v334_v58, %v296_v44  ;;  %v289_v6 = vld [vmem:[%s3287_s1 + $0x9] sm:$0x1]  ;;  %v290_v7 = vld [vmem:[%s3287_s1 + $0x11] sm:$0x1]  ;;  %v346_v16 = vrot.slane %v303_v57, 1 }
  0x10   :  { %v40_v8 = vld [vmem:[%s3289_s3 + $0x18] sm:$0xff]  ;;  %v159_v9 = vsel %vm158_vm7, %v157_v42, %v156_v2  ;;  %v337_v10 = vsel %vm143_vm2, %v336_v59, %v335_v4  ;;  %v292_v12 = vld [vmem:[%s3287_s1 + $0x21] sm:$0x1]  ;;  %v293_v13 = vld [vmem:[%s3287_s1 + $0x29] sm:$0x1]  ;;  %v320_v18 = vrot.slane %v289_v6, 7 }
  0x11   :  { %1795 = vmatmul.msk.f32.gmra.mxu0 %vm65_vm0, %v18_v56  ;;  %v291_v11 = vld [vmem:[%s3287_s1 + $0x19] sm:$0x1]  ;;  %62 = vperm.xlu0 %1926, %v40_v8   ;;  %v2265_v14 = vld [vmem:[%s3288_s2 + $0x50] sm:$0xff]  ;;  %v339_v15 = vsel %vm146_vm3, %v338_v60, %v337_v10  ;;  %v322_v19 = vrot.slane %v290_v7, 6  ;;  %v37_v20 = vld [vmem:[%s3289_s3] sm:$0xff]  ;;  %v326_v24 = vrot.slane %v292_v12, 4 }
  0x12   :  { %1799 = vmatpush.xpose.msk.msra.mxu1 %vm65_vm0, %v159_v9  ;;  %1919 = vmatpush.xpose.msk.msra.mxu3 %vm65_vm0, %v159_v9  ;;  %v294_v17 = vld [vmem:[%s3287_s1 + $0x31] sm:$0x1]  ;;  %v341_v21 = vsel %vm149_vm4, %v340_v62, %v339_v15  ;;  %v295_v22 = vld [vmem:[%s3287_s1 + $0x39] sm:$0x1]  ;;  %v324_v23 = vrot.slane %v291_v11, 5  ;;  %v321_v26 = vsel %vm140_vm1, %v320_v18, %v288_v1  ;;  %v328_v27 = vrot.slane %v293_v13, 3 }
  0x13   :  { %1797 = vmatmul.msk.f32.gmra.mxu2 %vm65_vm0, %v20_v0  ;;  %v343_v25 = vsel %vm152_vm5, %v342_v63, %v341_v21  ;;  %v665_v28 = vld [vmem:[%s3287_s1 + $0x4b] sm:$0x1]  ;;  %v323_v30 = vsel %vm143_vm2, %v322_v19, %v321_v26  ;;  %v330_v31 = vrot.slane %v294_v17, 2  ;;  %v39_v32 = vld [vmem:[%s3289_s3 + $0x10] sm:$0xff]  ;;  %v332_v37 = vrot.slane %v295_v22, 1  ;;  %v2318_v46 = vld [vmem:[%s3288_s2 + $0x58] sm:$0xff] }
  0x14   :  { %v345_v29 = vsel %vm155_vm6, %v344_v5, %v343_v25  ;;  %v666_v33 = vld [vmem:[%s3287_s1 + $0x53] sm:$0x1]  ;;  %v702_v34 = vrot.slane %v665_v28, 7  ;;  %v325_v36 = vsel %vm146_vm3, %v324_v23, %v323_v30  ;;  %v664_v38 = vld [vmem:[%s3287_s1 + $0x43] sm:$0x1]  ;;  %v2313_v45 = vld [vmem:[%s3288_s2 + $0x28] sm:$0xff] }
  0x15   :  { %1800 = vmatmul.msk.f32.vlgmr.msra.gmra.mxu1 %vm65_vm0, %v2236_v3  ;;  %1806 = vmatmul.msk.f32.vlgmr.msra.gmra.mxu3 %vm65_vm0, %v2265_v14  ;;  %v347_v35 = vsel %vm158_vm7, %v346_v16, %v345_v29  ;;  %v667_v39 = vld [vmem:[%s3287_s1 + $0x5b] sm:$0x1]  ;;  %v704_v40 = vrot.slane %v666_v33, 6  ;;  %v327_v41 = vsel %vm149_vm4, %v326_v24, %v325_v36  ;;  %v668_v42 = vld [vmem:[%s3287_s1 + $0x63] sm:$0x1]  ;;  %v2377_v22 = vld [vmem:[%s3288_s2 + $0x30] sm:$0xff] }
  0x16   :  { %47 = vperm.xlu1 %1927, %v37_v20   ;;  %1812 = vmatpush.xpose.msk.msrb.mxu3 %vm65_vm0, %v347_v35  ;;  %v703_v43 = vsel %vm140_vm1, %v702_v34, %v664_v38  ;;  %v706_v44 = vrot.slane %v667_v39, 5  ;;  %v329_v47 = vsel %vm152_vm5, %v328_v27, %v327_v41  ;;  %v669_v48 = vld [vmem:[%s3287_s1 + $0x6b] sm:$0x1]  ;;  %v708_v50 = vrot.slane %v668_v42, 4  ;;  %v670_v53 = vld [vmem:[%s3287_s1 + $0x73] sm:$0x1] }
  0x17   :  { %v705_v49 = vsel %vm143_vm2, %v704_v40, %v703_v43  ;;  %v657_v51 = vld [vmem:[%s3287_s1 + $0xb] sm:$0x1]  ;;  %v331_v52 = vsel %vm155_vm6, %v330_v31, %v329_v47  ;;  %v710_v55 = vrot.slane %v669_v48, 3  ;;  %v658_v56 = vld [vmem:[%s3287_s1 + $0x13] sm:$0x1]  ;;  %v712_v61 = vrot.slane %v670_v53, 2 }
  0x18   :  { %v707_v54 = vsel %vm146_vm3, %v706_v44, %v705_v49  ;;  %v688_v57 = vrot.slane %v657_v51, 7  ;;  %v333_v58 = vsel %vm158_vm7, %v332_v37, %v331_v52  ;;  %v671_v59 = vld [vmem:[%s3287_s1 + $0x7b] sm:$0x1]  ;;  %v656_v62 = vld [vmem:[%s3287_s1 + $0x3] sm:$0x1]  ;;  %v690_v63 = vrot.slane %v658_v56, 6 }
  0x19   :  { %57 = vperm.xlu0 %1926, %v39_v32   ;;  %v709_v60 = vsel %vm149_vm4, %v708_v50, %v707_v54  ;;  %v714_v1 = vrot.slane %v671_v59, 1  ;;  %v659_v2 = vld [vmem:[%s3287_s1 + $0x1b] sm:$0x1]  ;;  %v660_v4 = vld [vmem:[%s3287_s1 + $0x23] sm:$0x1]  ;;  %v2406_v26 = vld [vmem:[%s3288_s2 + $0x48] sm:$0xff] }
  0x1a   :  { %1813 = vmatpush.xpose.msk.msrb.mxu3 %vm65_vm0, %v333_v58  ;;  %v711_v0 = vsel %vm152_vm5, %v710_v55, %v709_v60  ;;  %v689_v5 = vsel %vm140_vm1, %v688_v57, %v656_v62  ;;  %v661_v7 = vld [vmem:[%s3287_s1 + $0x2b] sm:$0x1]  ;;  %v692_v9 = vrot.slane %v659_v2, 5  ;;  %v694_v10 = vrot.slane %v660_v4, 4  ;;  %v662_v12 = vld [vmem:[%s3287_s1 + $0x33] sm:$0x1] }
  0x1b   :  { %v713_v6 = vsel %vm155_vm6, %v712_v61, %v711_v0  ;;  %v691_v8 = vsel %vm143_vm2, %v690_v63, %v689_v5  ;;  %v663_v13 = vld [vmem:[%s3287_s1 + $0x3b] sm:$0x1]  ;;  %v696_v15 = vrot.slane %v661_v7, 3  ;;  %v698_v17 = vrot.slane %v662_v12, 2  ;;  %v2397_v25 = vld [vmem:[%s3288_s2 + $0x40] sm:$0xff] }
  0x1c   :  { %v715_v11 = vsel %vm158_vm7, %v714_v1, %v713_v6  ;;  %v693_v16 = vsel %vm146_vm3, %v692_v9, %v691_v8  ;;  %v700_v18 = vrot.slane %v663_v13, 1  ;;  %v2388_v24 = vld [vmem:[%s3288_s2 + $0x38] sm:$0xff]  ;;  %v479_v36 = vld [vmem:[%s3287_s1 + $0x4a] sm:$0x1]  ;;  %v480_v37 = vld [vmem:[%s3287_s1 + $0x52] sm:$0x1] }
  0x1d   :  { %1801 = vmatmul.msk.f32.gmra.mxu1 %vm65_vm0, %v2313_v45  ;;  %1807 = vmatmul.msk.f32.gmra.mxu3 %vm65_vm0, %v2318_v46  ;;  %v695_v19 = vsel %vm149_vm4, %v694_v10, %v693_v16  ;;  %v516_v38 = vrot.slane %v479_v36, 7  ;;  %v478_v39 = vld [vmem:[%s3287_s1 + $0x42] sm:$0x1]  ;;  %v481_v40 = vld [vmem:[%s3287_s1 + $0x5a] sm:$0x1]  ;;  %v518_v41 = vrot.slane %v480_v37, 6 }
  0x1e   :  { %1840 = vmatpush.xpose.msk.msrb.mxu1 %vm65_vm0, %v715_v11  ;;  %v697_v20 = vsel %vm152_vm5, %v696_v15, %v695_v19  ;;  %v482_v44 = vld [vmem:[%s3287_s1 + $0x62] sm:$0x1]  ;;  %v520_v48 = vrot.slane %v481_v40, 5  ;;  %v483_v50 = vld [vmem:[%s3287_s1 + $0x6a] sm:$0x1]  ;;  %vm1687_vm8 = vcmask 130048  }
  0x1f   :  { %v699_v21 = vsel %vm155_vm6, %v698_v17, %v697_v20  ;;  %v517_v47 = vsel %vm140_vm1, %v516_v38, %v478_v39  ;;  %v522_v52 = vrot.slane %v482_v44, 4  ;;  %v471_v53 = vld [vmem:[%s3287_s1 + $0xa] sm:$0x1]  ;;  %v484_v55 = vld [vmem:[%s3287_s1 + $0x72] sm:$0x1]  ;;  %v524_v57 = vrot.slane %v483_v50, 3 }
  0x20   :  { %v701_v23 = vsel %vm158_vm7, %v700_v18, %v699_v21  ;;  %v519_v51 = vsel %vm143_vm2, %v518_v41, %v517_v47  ;;  %v472_v58 = vld [vmem:[%s3287_s1 + $0x12] sm:$0x1]  ;;  %v502_v59 = vrot.slane %v471_v53, 7  ;;  %v470_v63 = vld [vmem:[%s3287_s1 + $0x2] sm:$0x1]  ;;  %v526_v10 = vrot.slane %v484_v55, 2 }
  0x21   :  { %v521_v56 = vsel %vm146_vm3, %v520_v48, %v519_v51  ;;  %v504_v0 = vrot.slane %v472_v58, 6  ;;  %v473_v5 = vld [vmem:[%s3287_s1 + $0x1a] sm:$0x1]  ;;  %v474_v6 = vld [vmem:[%s3287_s1 + $0x22] sm:$0x1]  ;;  %v2532_v44 = vld [vmem:[%s3288_s2 + $0x88] sm:$0xff] }
  0x22   :  { %1841 = vmatpush.xpose.msk.msrb.mxu1 %vm65_vm0, %v701_v23  ;;  %v523_v62 = vsel %vm149_vm4, %v522_v52, %v521_v56  ;;  %v503_v7 = vsel %vm140_vm1, %v502_v59, %v470_v63  ;;  %v485_v9 = vld [vmem:[%s3287_s1 + $0x7a] sm:$0x1]  ;;  %v475_v11 = vld [vmem:[%s3287_s1 + $0x2a] sm:$0x1]  ;;  %v506_v13 = vrot.slane %v473_v5, 5  ;;  %v508_v17 = vrot.slane %v474_v6, 4 }
  0x23   :  { %v505_v12 = vsel %vm143_vm2, %v504_v0, %v503_v7  ;;  %v525_v15 = vsel %vm152_vm5, %v524_v57, %v523_v62  ;;  %v476_v16 = vld [vmem:[%s3287_s1 + $0x32] sm:$0x1]  ;;  %v510_v18 = vrot.slane %v475_v11, 3  ;;  %v528_v23 = vrot.slane %v485_v9, 1  ;;  %v477_v36 = vld [vmem:[%s3287_s1 + $0x3a] sm:$0x1] }
  0x24   :  { %v507_v21 = vsel %vm146_vm3, %v506_v13, %v505_v12  ;;  %v512_v37 = vrot.slane %v476_v16, 2  ;;  %v2519_v39 = vld [vmem:[%s3288_s2 + $0x80] sm:$0xff]  ;;  %v514_v41 = vrot.slane %v477_v36, 1  ;;  %v2543_v50 = vld [vmem:[%s3288_s2 + $0x90] sm:$0xff]  ;;  %v2556_v56 = vld [vmem:[%s3288_s2 + $0x98] sm:$0xff] }
  0x25   :  { %1802 = vmatmul.msk.f32.gmra.mxu1 %vm65_vm0, %v2377_v22  ;;  %1814 = vmatmul.msk.f32.vlgmr.msrb.gmra.mxu3 %vm65_vm0, %v2236_v3  ;;  %v1038_v59 = vld [vmem:[%s3287_s1 + $0x55] sm:$0x1]  ;;  %v1036_v63 = vld [vmem:[%s3287_s1 + $0x45] sm:$0x1]  ;;  %v1039_v0 = vld [vmem:[%s3287_s1 + $0x5d] sm:$0x1] }
  0x26   :  { %v1078_v6 = vrot.slane %v1039_v0, 5  ;;  %v1041_v7 = vld [vmem:[%s3287_s1 + $0x6d] sm:$0x1]  ;;  %v1042_v11 = vld [vmem:[%s3287_s1 + $0x75] sm:$0x1] }
  0x27   :  { %v1082_v13 = vrot.slane %v1041_v7, 3  ;;  %v1043_v36 = vld [vmem:[%s3287_s1 + $0x7d] sm:$0x1] }
  0x2d   :  { %1803 = vmatmul.msk.f32.gmra.mxu1 %vm65_vm0, %v2388_v24  ;;  %1815 = vmatmul.msk.f32.gmra.mxu3 %vm65_vm0, %v2313_v45 }
  0x35   :  { %1804 = vmatmul.msk.f32.gmra.mxu1 %vm65_vm0, %v2397_v25  ;;  %1816 = vmatmul.msk.f32.gmra.mxu3 %vm65_vm0, %v2377_v22 }
  0x3d   :  { %1805 = vmatmul.msk.f32.gmra.mxu1 %vm65_vm0, %v2406_v26  ;;  %1817 = vmatmul.msk.f32.gmra.mxu3 %vm65_vm0, %v2388_v24 }
  0x45   :  { %1842 = vmatmul.msk.f32.vlgmr.msrb.gmra.mxu1 %vm65_vm0, %v2236_v3  ;;  %1818 = vmatmul.msk.f32.gmra.mxu3 %vm65_vm0, %v2397_v25 }
  0x4d   :  { %1843 = vmatmul.msk.f32.gmra.mxu1 %vm65_vm0, %v2313_v45  ;;  %1819 = vmatmul.msk.f32.gmra.mxu3 %vm65_vm0, %v2406_v26 }
  0x55   :  { %1844 = vmatmul.msk.f32.gmra.mxu1 %vm65_vm0, %v2377_v22  ;;  %1820 = vmatmul.msk.f32.gmra.mxu3 %vm65_vm0, %v2265_v14 }
  0x5d   :  { %1845 = vmatmul.msk.f32.gmra.mxu1 %vm65_vm0, %v2388_v24  ;;  %1821 = vmatmul.msk.f32.gmra.mxu3 %vm65_vm0, %v2318_v46 }
  0x65   :  { %1846 = vmatmul.msk.f32.gmra.mxu1 %vm65_vm0, %v2397_v25 }
  0x6d   :  { %1847 = vmatmul.msk.f32.gmra.mxu1 %vm65_vm0, %v2406_v26 }
  0x75   :  { %1848 = vmatmul.msk.f32.gmra.mxu1 %vm65_vm0, %v2265_v14 }
  0x7d   :  { %1849 = vmatmul.msk.f32.gmra.mxu1 %vm65_vm0, %v2318_v46 }
  0x80   :  { %v53_v33 = vpop.permute.xlu1 %52 }
  0x83   :  { %v63_v30 = vpop.permute.xlu0 %62 }
  0x86   :  { %v95_v32 = vpop.f32.mrf.mxu0 }
  0x88   :  { %v48_v1 = vpop.permute.xlu1 %47 }
  0x89   :  { %v2503_v19 = vadd.f32 %v95_v32, %v48_v1  ;;  %v1076_v1 = vrot.slane %v1038_v59, 6 }
  0x8b   :  { %v58_v42 = vpop.permute.xlu0 %57 }
  0x8c   :  { %v101_v31 = vpop.f32.mrf.mxu2 }
  0x8d   :  { %v2474_v60 = vadd.f32 %v101_v31, %v58_v42 }
  0x8e   :  { %v98_v49 = vpop.f32.mrf.mxu0 }
  0x8f   :  { %v2482_v2 = vadd.f32 %v98_v49, %v53_v33  ;;  %v527_v33 = vsel %vm155_vm6, %v526_v10, %v525_v15  ;;  %v1029_v10 = vld [vmem:[%s3287_s1 + $0xd] sm:$0x1]  ;;  %v1030_v15 = vld [vmem:[%s3287_s1 + $0x15] sm:$0x1] }
  0x90   :  { %v529_v40 = vsel %vm158_vm7, %v528_v23, %v527_v33  ;;  %v1060_v16 = vrot.slane %v1029_v10, 7  ;;  %v1031_v23 = vld [vmem:[%s3287_s1 + $0x1d] sm:$0x1] }
  0x92   :  { %v2436_v27 = vpop.f32.mrf.mxu1 }
  0x96   :  { %v104_v43 = vpop.f32.mrf.mxu2 }
  0x97   :  { %v2476_v61 = vadd.f32 %v104_v43, %v63_v30  ;;  %v509_v30 = vsel %vm149_vm4, %v508_v17, %v507_v21 }
  0x98   :  { %v2438_v28 = vpop.f32.mrf.mxu3  ;;  %v511_v38 = vsel %vm152_vm5, %v510_v18, %v509_v30  ;;  %v1028_v18 = vld [vmem:[%s3287_s1 + $0x5] sm:$0x1] }
  0x99   :  { %v513_v42 = vsel %vm155_vm6, %v512_v37, %v511_v38  ;;  %v1032_v30 = vld [vmem:[%s3287_s1 + $0x25] sm:$0x1]  ;;  %v1084_v37 = vrot.slane %v1042_v11, 2 }
  0x9a   :  { %v222_v29 = vpop.f32.mrf.mxu1 }
  0x9b   :  { %v244_v31 = vmul.f32 %v222_v29, %v2482_v2 }
  0xa0   :  { %v2440_v34 = vpop.f32.mrf.mxu3 }
  0xa2   :  { %v225_v35 = vpop.f32.mrf.mxu1 }
  0xa3   :  { %v245_v20 = vmul.f32 %v225_v35, %v2474_v60  ;;  %v243_v35 = vmul.f32 %v2436_v27, %v2503_v19  ;;  %v515_v27 = vsel %vm158_vm7, %v514_v41, %v513_v42  ;;  %v1034_v41 = vld [vmem:[%s3287_s1 + $0x35] sm:$0x1]  ;;  %v1066_v42 = vrot.slane %v1032_v30, 4 }
  0xa4   :  { %v1070_v59 = vrot.slane %v1034_v41, 2 }
  0xa8   :  { %v2465_v54 = vpop.f32.mrf.mxu3 }
  0xa9   :  { %v393_v55 = vmul.f32 %v2465_v54, %v2503_v19  ;;  %v1037_v54 = vld [vmem:[%s3287_s1 + $0x4d] sm:$0x1] }
  0xaa   :  { %v228_v4 = vpop.f32.mrf.mxu1  ;;  %v1074_v62 = vrot.slane %v1037_v54, 7  ;;  %v1035_v54 = vld [vmem:[%s3287_s1 + $0x3d] sm:$0x1] }
  0xab   :  { %v246_v8 = vmul.f32 %v228_v4, %v2476_v61  ;;  %v1040_v4 = vld [vmem:[%s3287_s1 + $0x65] sm:$0x1] }
  0xac   :  { %v1075_v5 = vsel %vm140_vm1, %v1074_v62, %v1036_v63  ;;  %v1080_v9 = vrot.slane %v1040_v4, 4 }
  0xad   :  { %271 = vmatpush.msrb.mxu2 %v246_v8  ;;  %v1077_v8 = vsel %vm143_vm2, %v1076_v1, %v1075_v5 }
  0xae   :  { %v1079_v12 = vsel %vm146_vm3, %v1078_v6, %v1077_v8 }
  0xaf   :  { %272 = vmatpush.msrb.mxu2 %v245_v20  ;;  %v1081_v17 = vsel %vm149_vm4, %v1080_v9, %v1079_v12  ;;  %v1062_v20 = vrot.slane %v1030_v15, 6 }
  0xb0   :  { %v372_v32 = vpop.f32.mrf.mxu3 }
  0xb1   :  { %273 = vmatpush.msrb.mxu2 %v244_v31  ;;  %v394_v53 = vmul.f32 %v372_v32, %v2482_v2  ;;  %v1061_v31 = vsel %vm140_vm1, %v1060_v16, %v1028_v18  ;;  %v1033_v32 = vld [vmem:[%s3287_s1 + $0x2d] sm:$0x1] }
  0xb2   :  { %v2521_v29 = vpop.f32.mrf.mxu1  ;;  %v1063_v38 = vsel %vm143_vm2, %v1062_v20, %v1061_v31 }
  0xb3   :  { %274 = vmatpush.msrb.mxu2 %v243_v35  ;;  %v1064_v35 = vrot.slane %v1031_v23, 5 }
  0xb4   :  { %1808 = vmatmul.msk.f32.vlgmr.msrb.gmra.mxu2 %vm65_vm0, %v2519_v39 }
  0xb5   :  { %1826 = vmatpush.xpose.msk.msra.mxu2 %vm65_vm0, %v529_v40  ;;  %v1083_v40 = vsel %vm152_vm5, %v1082_v13, %v1081_v17 }
  0xb8   :  { %v375_v43 = vpop.f32.mrf.mxu3 }
  0xb9   :  { %1827 = vmatpush.xpose.msk.msra.mxu2 %vm65_vm0, %v515_v27  ;;  %v395_v52 = vmul.f32 %v375_v43, %v2474_v60  ;;  %v1068_v27 = vrot.slane %v1033_v32, 3 }
  0xba   :  { %v2535_v47 = vpop.f32.mrf.mxu1 }
  0xbc   :  { %1809 = vmatmul.msk.f32.gmra.mxu2 %vm65_vm0, %v2532_v44 }
  0xc0   :  { %v378_v48 = vpop.f32.mrf.mxu3 }
  0xc1   :  { %v396_v49 = vmul.f32 %v378_v48, %v2476_v61  ;;  %v1065_v48 = vsel %vm146_vm3, %v1064_v35, %v1063_v38 }
  0xc2   :  { %v2545_v51 = vpop.f32.mrf.mxu1 }
  0xc3   :  { %409 = vmatpush.msrb.mxu0 %v396_v49  ;;  %v1086_v49 = vrot.slane %v1043_v36, 1 }
  0xc4   :  { %1810 = vmatmul.msk.f32.gmra.mxu2 %vm65_vm0, %v2543_v50 }
  0xc5   :  { %410 = vmatpush.msrb.mxu0 %v395_v52  ;;  %v1067_v52 = vsel %vm149_vm4, %v1066_v42, %v1065_v48 }
  0xc6   :  { %v1069_v62 = vsel %vm152_vm5, %v1068_v27, %v1067_v52 }
  0xc7   :  { %411 = vmatpush.msrb.mxu0 %v394_v53  ;;  %v1071_v0 = vsel %vm155_vm6, %v1070_v59, %v1069_v62 }
  0xc8   :  { %v381_v5 = vpop.f32.mrf.mxu3 }
  0xc9   :  { %412 = vmatpush.msrb.mxu0 %v393_v55  ;;  %v1085_v55 = vsel %vm155_vm6, %v1084_v37, %v1083_v40 }
  0xca   :  { %1822 = vmatmul.msk.f32.vlgmr.msrb.gmra.mxu0 %vm65_vm0, %v2519_v39  ;;  %v740_v57 = vpop.f32.mrf.mxu1  ;;  %v1087_v63 = vsel %vm158_vm7, %v1086_v49, %v1085_v55 }
  0xcb   :  { %v762_v53 = vmul.f32 %v740_v57, %v2482_v2  ;;  %v1072_v57 = vrot.slane %v1035_v54, 1 }
  0xcc   :  { %1811 = vmatmul.msk.f32.gmra.mxu2 %vm65_vm0, %v2556_v56 }
  0xd0   :  { %v384_v9 = vpop.f32.mrf.mxu3 }
  0xd2   :  { %1823 = vmatmul.msk.f32.gmra.mxu0 %vm65_vm0, %v2532_v44  ;;  %v743_v58 = vpop.f32.mrf.mxu1 }
  0xd3   :  { %v763_v43 = vmul.f32 %v743_v58, %v2474_v60  ;;  %v761_v58 = vmul.f32 %v2545_v51, %v2503_v19  ;;  %v1073_v51 = vsel %vm158_vm7, %v1072_v57, %v1071_v0 }
  0xd4   :  { %1828 = vmatmul.msk.f32.vlgmr.msra.gmra.mxu2 %vm65_vm0, %v2236_v3 }
  0xda   :  { %1824 = vmatmul.msk.f32.gmra.mxu0 %vm65_vm0, %v2543_v50  ;;  %v746_v21 = vpop.f32.mrf.mxu1 }
  0xdb   :  { %v764_v33 = vmul.f32 %v746_v21, %v2476_v61  ;;  %v387_v21 = vpop.f32.mrf.mxu3 }
  0xdc   :  { %1829 = vmatmul.msk.f32.gmra.mxu2 %vm65_vm0, %v2313_v45 }
  0xdd   :  { %777 = vmatpush.msra.mxu3 %v764_v33 }
  0xdf   :  { %778 = vmatpush.msra.mxu3 %v763_v43 }
  0xe1   :  { %779 = vmatpush.msra.mxu3 %v762_v53 }
  0xe2   :  { %1825 = vmatmul.msk.f32.gmra.mxu0 %vm65_vm0, %v2556_v56 }
  0xe3   :  { %780 = vmatpush.msra.mxu3 %v761_v58  ;;  %v390_v52 = vpop.f32.mrf.mxu3 }
  0xe4   :  { %1830 = vmatmul.msk.f32.gmra.mxu2 %vm65_vm0, %v2377_v22  ;;  %1850 = vmatmul.msk.f32.vlgmr.msra.gmra.mxu3 %vm65_vm0, %v2519_v39 }
  0xe5   :  { %1868 = vmatpush.xpose.msk.msrb.mxu3 %vm65_vm0, %v1087_v63 }
  0xe9   :  { %1869 = vmatpush.xpose.msk.msrb.mxu3 %vm65_vm0, %v1073_v51 }
  0xec   :  { %1831 = vmatmul.msk.f32.gmra.mxu2 %vm65_vm0, %v2388_v24  ;;  %1851 = vmatmul.msk.f32.gmra.mxu3 %vm65_vm0, %v2532_v44 }
  0xf4   :  { %1852 = vmatmul.msk.f32.gmra.mxu3 %vm65_vm0, %v2543_v50  ;;  %1832 = vmatmul.msk.f32.gmra.mxu2 %vm65_vm0, %v2397_v25 }
  0xfc   :  { %1853 = vmatmul.msk.f32.gmra.mxu3 %vm65_vm0, %v2556_v56  ;;  %1833 = vmatmul.msk.f32.gmra.mxu2 %vm65_vm0, %v2406_v26 }
 0x104   :  { %1870 = vmatmul.msk.f32.vlgmr.msrb.gmra.mxu3 %vm65_vm0, %v2236_v3  ;;  %1834 = vmatmul.msk.f32.gmra.mxu2 %vm65_vm0, %v2265_v14 }
 0x10c   :  { %1871 = vmatmul.msk.f32.gmra.mxu3 %vm65_vm0, %v2313_v45  ;;  %1835 = vmatmul.msk.f32.gmra.mxu2 %vm65_vm0, %v2318_v46 }
 0x114   :  { %1872 = vmatmul.msk.f32.gmra.mxu3 %vm65_vm0, %v2377_v22 }
 0x11c   :  { %1873 = vmatmul.msk.f32.gmra.mxu3 %vm65_vm0, %v2388_v24 }
 0x124   :  { %1874 = vmatmul.msk.f32.gmra.mxu3 %vm65_vm0, %v2397_v25 }
 0x12c   :  { %1875 = vmatmul.msk.f32.gmra.mxu3 %vm65_vm0, %v2406_v26 }
 0x134   :  { %1876 = vmatmul.msk.f32.gmra.mxu3 %vm65_vm0, %v2265_v14 }
 0x137   :  { %v276_v1 = vpop.f32.mrf.mxu2 }
 0x13c   :  { %1877 = vmatmul.msk.f32.gmra.mxu3 %vm65_vm0, %v2318_v46 }
 0x13f   :  { %v279_v4 = vpop.f32.mrf.mxu2 }
 0x147   :  { %v282_v6 = vpop.f32.mrf.mxu2  ;;  %v414_v7 = vpop.f32.mrf.mxu0 }
 0x148   :  { %v2677_v8 = vmax.f32 %v276_v1, %v414_v7 }
 0x14a   :  { %v430_v10 = vsub.f32 %v276_v1, %v2677_v8  ;;  %v442_v11 = vsub.f32 %v414_v7, %v2677_v8 }
 0x14c   :  { %v434_v12 = vmul.f32 1.442695, %v430_v10  ;;  %v446_v13 = vmul.f32 1.442695, %v442_v11 }
 0x14e   :  { %1939 = vpow2.f32 %v434_v12  ;;  %v851_v12 = vld [vmem:[%s3287_s1 + $0x4c] sm:$0x1] }
 0x14f   :  { %1941 = vpow2.f32 %v446_v13  ;;  %v285_v15 = vpop.f32.mrf.mxu2  ;;  %v417_v16 = vpop.f32.mrf.mxu0  ;;  %v852_v13 = vld [vmem:[%s3287_s1 + $0x54] sm:$0x1] }
 0x150   :  { %v2681_v17 = vmax.f32 %v279_v4, %v417_v16 }
 0x152   :  { %v431_v18 = vsub.f32 %v279_v4, %v2681_v17  ;;  %v443_v20 = vsub.f32 %v417_v16, %v2681_v17  ;;  %v853_v16 = vld [vmem:[%s3287_s1 + $0x5c] sm:$0x1] }
 0x154   :  { %v1940_v23 = vpop.eup %1939  ;;  %v436_v30 = vmul.f32 1.442695, %v431_v18  ;;  %v448_v31 = vmul.f32 1.442695, %v443_v20  ;;  %v890_v18 = vrot.slane %v852_v13, 6 }
 0x155   :  { %v1942_v33 = vpop.eup %1941  ;;  %v458_v36 = vmul.f32 %v1940_v23, %v2521_v29  ;;  %v847_v13 = vld [vmem:[%s3287_s1 + $0x2c] sm:$0x1] }
 0x156   :  { %v2686_v37 = vadd.f32 %v1942_v33, %v1940_v23  ;;  %1943 = vpow2.f32 %v436_v30  ;;  %v462_v32 = vmul.f32 %v1942_v33, %v381_v5  ;;  %v892_v30 = vrot.slane %v853_v16, 5  ;;  %v855_v33 = vld [vmem:[%s3287_s1 + $0x6c] sm:$0x1] }
 0x157   :  { %1945 = vpow2.f32 %v448_v31  ;;  %v420_v38 = vpop.f32.mrf.mxu0  ;;  %v2688_v35 = vpop.f32.mrf.mxu2 }
 0x158   :  { %v2690_v40 = vmax.f32 %v282_v6, %v420_v38  ;;  %v2692_v41 = vadd.f32 %v462_v32, %v458_v36 }
 0x15a   :  { %v432_v42 = vsub.f32 %v282_v6, %v2690_v40  ;;  %v444_v27 = vsub.f32 %v420_v38, %v2690_v40  ;;  %v843_v38 = vld [vmem:[%s3287_s1 + $0xc] sm:$0x1] }
 0x15c   :  { %v1944_v43 = vpop.eup %1943  ;;  %v438_v48 = vmul.f32 1.442695, %v432_v42  ;;  %v450_v49 = vmul.f32 1.442695, %v444_v27  ;;  %v856_v27 = vld [vmem:[%s3287_s1 + $0x74] sm:$0x1] }
 0x15d   :  { %v1946_v29 = vpop.eup %1945  ;;  %v459_v53 = vmul.f32 %v1944_v43, %v2535_v47 }
 0x15e   :  { %v2697_v55 = vadd.f32 %v1946_v29, %v1944_v43  ;;  %1947 = vpow2.f32 %v438_v48  ;;  %v463_v54 = vmul.f32 %v1946_v29, %v384_v9  ;;  %v896_v48 = vrot.slane %v855_v33, 3 }
 0x15f   :  { %1949 = vpow2.f32 %v450_v49  ;;  %v423_v59 = vpop.f32.mrf.mxu0  ;;  %v554_v62 = vpop.f32.mrf.mxu2  ;;  %v844_v49 = vld [vmem:[%s3287_s1 + $0x14] sm:$0x1]  ;;  %v874_v29 = vrot.slane %v843_v38, 7 }
 0x160   :  { %v2699_v58 = vmax.f32 %v285_v15, %v423_v59  ;;  %v2701_v63 = vadd.f32 %v463_v54, %v459_v53  ;;  %v576_v33 = vmul.f32 %v554_v62, %v2482_v2 }
 0x162   :  { %v433_v57 = vsub.f32 %v285_v15, %v2699_v58  ;;  %v445_v0 = vsub.f32 %v423_v59, %v2699_v58  ;;  %v888_v15 = vrot.slane %v851_v12, 7  ;;  %v857_v59 = vld [vmem:[%s3287_s1 + $0x7c] sm:$0x1] }
 0x164   :  { %v1948_v51 = vpop.eup %1947  ;;  %v440_v1 = vmul.f32 1.442695, %v433_v57  ;;  %v452_v4 = vmul.f32 1.442695, %v445_v0  ;;  %v842_v57 = vld [vmem:[%s3287_s1 + $0x4] sm:$0x1] }
 0x165   :  { %v1950_v5 = vpop.eup %1949  ;;  %v460_v47 = vmul.f32 %v1948_v51, %v2438_v28  ;;  %v850_v28 = vld [vmem:[%s3287_s1 + $0x44] sm:$0x1]  ;;  %v876_v0 = vrot.slane %v844_v49, 6 }
 0x166   :  { %v2706_v6 = vadd.f32 %v1950_v5, %v1948_v51  ;;  %1951 = vpow2.f32 %v440_v1  ;;  %v464_v7 = vmul.f32 %v1950_v5, %v387_v21  ;;  %v854_v21 = vld [vmem:[%s3287_s1 + $0x64] sm:$0x1]  ;;  %v889_v23 = vsel %vm140_vm1, %v888_v15, %v850_v28  ;;  %v845_v5 = vld [vmem:[%s3287_s1 + $0x1c] sm:$0x1] }
 0x167   :  { %1953 = vpow2.f32 %v452_v4  ;;  %v557_v9 = vpop.f32.mrf.mxu2  ;;  %v2708_v10 = vpop.f32.mrf.mxu3  ;;  %v891_v36 = vsel %vm143_vm2, %v890_v18, %v889_v23  ;;  %v894_v32 = vrot.slane %v854_v21, 4  ;;  %v898_v4 = vrot.slane %v856_v27, 2 }
 0x168   :  { %v2710_v11 = vadd.f32 %v464_v7, %v460_v47  ;;  %v893_v43 = vsel %vm146_vm3, %v892_v30, %v891_v36  ;;  %v846_v47 = vld [vmem:[%s3287_s1 + $0x24] sm:$0x1]  ;;  %v875_v7 = vsel %vm140_vm1, %v874_v29, %v842_v57  ;;  %v577_v16 = vmul.f32 %v557_v9, %v2474_v60 }
 0x169   :  { %v877_v15 = vsel %vm143_vm2, %v876_v0, %v875_v7  ;;  %v878_v18 = vrot.slane %v845_v5, 5  ;;  %v880_v21 = vrot.slane %v846_v47, 4  ;;  %v882_v23 = vrot.slane %v847_v13, 3  ;;  %v1409_v0 = vld [vmem:[%s3287_s1 + $0x4f] sm:$0x1] }
 0x16a   :  { %v900_v30 = vrot.slane %v857_v59, 1  ;;  %v575_v9 = vmul.f32 %v2688_v35, %v2503_v19  ;;  %v1411_v5 = vld [vmem:[%s3287_s1 + $0x5f] sm:$0x1]  ;;  %v1412_v7 = vld [vmem:[%s3287_s1 + $0x67] sm:$0x1] }
 0x16b   :  { %v879_v38 = vsel %vm146_vm3, %v878_v18, %v877_v15  ;;  %v1450_v13 = vrot.slane %v1411_v5, 5  ;;  %v1401_v18 = vld [vmem:[%s3287_s1 + $0xf] sm:$0x1] }
 0x16c   :  { %v2724_v20 = vpop.eup %1951  ;;  %v881_v27 = vsel %vm149_vm4, %v880_v21, %v879_v38  ;;  %v1414_v21 = vld [vmem:[%s3287_s1 + $0x77] sm:$0x1]  ;;  %v1415_v38 = vld [vmem:[%s3287_s1 + $0x7f] sm:$0x1] }
 0x16d   :  { %v2730_v31 = vpop.eup %1953  ;;  %v461_v42 = vmul.f32 %v2724_v20, %v2440_v34  ;;  %v895_v34 = vsel %vm149_vm4, %v894_v32, %v893_v43  ;;  %v849_v32 = vld [vmem:[%s3287_s1 + $0x3c] sm:$0x1]  ;;  %v883_v43 = vsel %vm152_vm5, %v882_v23, %v881_v27  ;;  %v1400_v27 = vld [vmem:[%s3287_s1 + $0x7] sm:$0x1] }
 0x16e   :  { %v465_v51 = vmul.f32 %v2730_v31, %v390_v52  ;;  %v897_v12 = vsel %vm152_vm5, %v896_v48, %v895_v34  ;;  %v848_v52 = vld [vmem:[%s3287_s1 + $0x34] sm:$0x1]  ;;  %v886_v49 = vrot.slane %v849_v32, 1 }
 0x16f   :  { %v560_v53 = vpop.f32.mrf.mxu2  ;;  %v2748_v54 = vpop.f32.mrf.mxu3  ;;  %v899_v36 = vsel %vm155_vm6, %v898_v4, %v897_v12  ;;  %v1408_v4 = vld [vmem:[%s3287_s1 + $0x47] sm:$0x1] }
 0x170   :  { %v578_v1 = vmul.f32 %v560_v53, %v2476_v61  ;;  %v2774_v28 = vadd.f32 %v465_v51, %v461_v42  ;;  %v884_v42 = vrot.slane %v848_v52, 2  ;;  %v901_v62 = vsel %vm158_vm7, %v900_v30, %v899_v36  ;;  %v1410_v51 = vld [vmem:[%s3287_s1 + $0x57] sm:$0x1]  ;;  %v1413_v52 = vld [vmem:[%s3287_s1 + $0x6f] sm:$0x1] }
 0x171   :  { %v1448_v47 = vrot.slane %v1410_v51, 6  ;;  %v1454_v30 = vrot.slane %v1413_v52, 3  ;;  %v1432_v36 = vrot.slane %v1401_v18, 7  ;;  %v1405_v51 = vld [vmem:[%s3287_s1 + $0x2f] sm:$0x1] }
 0x172   :  { %591 = vmatpush.msra.mxu0 %v578_v1  ;;  %v885_v29 = vsel %vm155_vm6, %v884_v42, %v883_v43  ;;  %v1446_v1 = vrot.slane %v1409_v0, 7 }
 0x173   :  { %v887_v53 = vsel %vm158_vm7, %v886_v49, %v885_v29  ;;  %v1403_v49 = vld [vmem:[%s3287_s1 + $0x1f] sm:$0x1]  ;;  %v1404_v29 = vld [vmem:[%s3287_s1 + $0x27] sm:$0x1] }
 0x174   :  { %592 = vmatpush.msra.mxu0 %v577_v16  ;;  %v1447_v12 = vsel %vm140_vm1, %v1446_v1, %v1408_v4  ;;  %v1452_v16 = vrot.slane %v1412_v7, 4  ;;  %v1406_v1 = vld [vmem:[%s3287_s1 + $0x37] sm:$0x1]  ;;  %v1438_v7 = vrot.slane %v1404_v29, 4 }
 0x175   :  { %v1449_v15 = vsel %vm143_vm2, %v1448_v47, %v1447_v12  ;;  %v1436_v47 = vrot.slane %v1403_v49, 5  ;;  %v1440_v12 = vrot.slane %v1405_v51, 3 }
 0x176   :  { %593 = vmatpush.msra.mxu0 %v576_v33  ;;  %v1451_v23 = vsel %vm146_vm3, %v1450_v13, %v1449_v15  ;;  %v1402_v33 = vld [vmem:[%s3287_s1 + $0x17] sm:$0x1]  ;;  %v1458_v13 = vrot.slane %v1415_v38, 1 }
 0x177   :  { %v2787_v48 = vpop.f32.mrf.mxu3  ;;  %v1453_v42 = vsel %vm149_vm4, %v1452_v16, %v1451_v23  ;;  %v1407_v16 = vld [vmem:[%s3287_s1 + $0x3f] sm:$0x1] }
 0x178   :  { %594 = vmatpush.msra.mxu0 %v575_v9  ;;  %v1434_v9 = vrot.slane %v1402_v33, 6  ;;  %v1455_v0 = vsel %vm152_vm5, %v1454_v30, %v1453_v42 }
 0x179   :  { %1836 = vmatmul.msk.f32.vlgmr.msra.gmra.mxu0 %vm65_vm0, %v2519_v39 }
 0x17a   :  { %1854 = vmatpush.xpose.msk.msrb.mxu0 %vm65_vm0, %v901_v62  ;;  %v1456_v62 = vrot.slane %v1414_v21, 2  ;;  %v1442_v21 = vrot.slane %v1406_v1, 2 }
 0x17c   :  { %v1457_v15 = vsel %vm155_vm6, %v1456_v62, %v1455_v0  ;;  %v749_v62 = vpop.f32.mrf.mxu1 }
 0x17d   :  { %v1459_v33 = vsel %vm158_vm7, %v1458_v13, %v1457_v15 }
 0x17e   :  { %1855 = vmatpush.xpose.msk.msrb.mxu0 %vm65_vm0, %v887_v53  ;;  %v1433_v53 = vsel %vm140_vm1, %v1432_v36, %v1400_v27 }
 0x17f   :  { %v2796_v35 = vpop.f32.mrf.mxu3  ;;  %v1435_v4 = vsel %vm143_vm2, %v1434_v9, %v1433_v53 }
 0x180   :  { %v1437_v18 = vsel %vm146_vm3, %v1436_v47, %v1435_v4 }
 0x181   :  { %1837 = vmatmul.msk.f32.gmra.mxu0 %vm65_vm0, %v2532_v44  ;;  %v1439_v23 = vsel %vm149_vm4, %v1438_v7, %v1437_v18 }
 0x182   :  { %v1441_v30 = vsel %vm152_vm5, %v1440_v12, %v1439_v23 }
 0x183   :  { %v1443_v36 = vsel %vm155_vm6, %v1442_v21, %v1441_v30 }
 0x184   :  { %v752_v30 = vpop.f32.mrf.mxu1 }
 0x187   :  { %v1109_v59 = vpop.f32.mrf.mxu3 }
 0x189   :  { %1838 = vmatmul.msk.f32.gmra.mxu0 %vm65_vm0, %v2543_v50 }
 0x18f   :  { %v1112_v34 = vpop.f32.mrf.mxu3 }
 0x190   :  { %v1134_v52 = vmul.f32 %v1112_v34, %v2482_v2  ;;  %v1444_v34 = vrot.slane %v1407_v16, 1 }
 0x191   :  { %1839 = vmatmul.msk.f32.gmra.mxu0 %vm65_vm0, %v2556_v56 }
 0x197   :  { %v1115_v57 = vpop.f32.mrf.mxu3 }
 0x198   :  { %v1135_v5 = vmul.f32 %v1115_v57, %v2474_v60  ;;  %v1133_v57 = vmul.f32 %v1109_v59, %v2503_v19 }
 0x199   :  { %1856 = vmatmul.msk.f32.vlgmr.msrb.gmra.mxu0 %vm65_vm0, %v2236_v3 }
 0x19f   :  { %v1118_v32 = vpop.f32.mrf.mxu3 }
 0x1a0   :  { %v1136_v43 = vmul.f32 %v1118_v32, %v2476_v61  ;;  %v1445_v32 = vsel %vm158_vm7, %v1444_v34, %v1443_v36 }
 0x1a1   :  { %1857 = vmatmul.msk.f32.gmra.mxu0 %vm65_vm0, %v2313_v45 }
 0x1a2   :  { %1149 = vmatpush.msra.mxu1 %v1136_v43 }
 0x1a4   :  { %1150 = vmatpush.msra.mxu1 %v1135_v5 }
 0x1a6   :  { %1151 = vmatpush.msra.mxu1 %v1134_v52 }
 0x1a8   :  { %1152 = vmatpush.msra.mxu1 %v1133_v57 }
 0x1a9   :  { %1858 = vmatmul.msk.f32.gmra.mxu0 %vm65_vm0, %v2377_v22  ;;  %1878 = vmatmul.msk.f32.vlgmr.msra.gmra.mxu1 %vm65_vm0, %v2519_v39 }
 0x1aa   :  { %1896 = vmatpush.xpose.msk.msrb.mxu1 %vm65_vm0, %v1459_v33 }
 0x1ae   :  { %1897 = vmatpush.xpose.msk.msrb.mxu1 %vm65_vm0, %v1445_v32 }
 0x1b1   :  { %1859 = vmatmul.msk.f32.gmra.mxu0 %vm65_vm0, %v2388_v24  ;;  %1879 = vmatmul.msk.f32.gmra.mxu1 %vm65_vm0, %v2532_v44 }
 0x1b9   :  { %1880 = vmatmul.msk.f32.gmra.mxu1 %vm65_vm0, %v2543_v50  ;;  %1860 = vmatmul.msk.f32.gmra.mxu0 %vm65_vm0, %v2397_v25 }
 0x1c1   :  { %1881 = vmatmul.msk.f32.gmra.mxu1 %vm65_vm0, %v2556_v56  ;;  %1861 = vmatmul.msk.f32.gmra.mxu0 %vm65_vm0, %v2406_v26 }
 0x1c9   :  { %1898 = vmatmul.msk.f32.vlgmr.msrb.gmra.mxu1 %vm65_vm0, %v2236_v3  ;;  %1862 = vmatmul.msk.f32.gmra.mxu0 %vm65_vm0, %v2265_v14 }
 0x1d1   :  { %1899 = vmatmul.msk.f32.gmra.mxu1 %vm65_vm0, %v2313_v45  ;;  %1863 = vmatmul.msk.f32.gmra.mxu0 %vm65_vm0, %v2318_v46 }
 0x1d9   :  { %1900 = vmatmul.msk.f32.gmra.mxu1 %vm65_vm0, %v2377_v22 }
 0x1e1   :  { %1901 = vmatmul.msk.f32.gmra.mxu1 %vm65_vm0, %v2388_v24 }
 0x1e9   :  { %1902 = vmatmul.msk.f32.gmra.mxu1 %vm65_vm0, %v2397_v25 }
 0x1f1   :  { %1903 = vmatmul.msk.f32.gmra.mxu1 %vm65_vm0, %v2406_v26  ;;  %v563_v26 = vpop.f32.mrf.mxu2 }
 0x1f6   :  { %v596_v3 = vpop.f32.mrf.mxu0 }
 0x1f7   :  { %v608_v59 = vmax.f32 %v2677_v8, %v596_v3 }
 0x1f9   :  { %v612_v45 = vsub.f32 %v2677_v8, %v608_v59  ;;  %v624_v38 = vsub.f32 %v596_v3, %v608_v59  ;;  %v2911_v42 = vmax.f32 %v608_v59, %v2708_v10  ;;  %1904 = vmatmul.msk.f32.gmra.mxu1 %vm65_vm0, %v2265_v14  ;;  %v566_v16 = vpop.f32.mrf.mxu2 }
 0x1fb   :  { %v616_v22 = vmul.f32 1.442695, %v612_v45  ;;  %v628_v24 = vmul.f32 1.442695, %v624_v38  ;;  %v798_v27 = vsub.f32 %v608_v59, %v2911_v42  ;;  %v810_v25 = vsub.f32 %v2708_v10, %v2911_v42 }
 0x1fd   :  { %1955 = vpow2.f32 %v616_v22  ;;  %v802_v9 = vmul.f32 1.442695, %v798_v27  ;;  %v814_v43 = vmul.f32 1.442695, %v810_v25 }
 0x1fe   :  { %1957 = vpow2.f32 %v628_v24  ;;  %v599_v8 = vpop.f32.mrf.mxu0 }
 0x1ff   :  { %v609_v49 = vmax.f32 %v2681_v17, %v599_v8  ;;  %1959 = vpow2.f32 %v814_v43 }
 0x200   :  { %1961 = vpow2.f32 %v802_v9 }
 0x201   :  { %v613_v14 = vsub.f32 %v2681_v17, %v609_v49  ;;  %v625_v29 = vsub.f32 %v599_v8, %v609_v49  ;;  %v2921_v53 = vmax.f32 %v609_v49, %v2748_v54  ;;  %1905 = vmatmul.msk.f32.gmra.mxu1 %vm65_vm0, %v2318_v46 }
 0x203   :  { %v1956_v10 = vpop.eup %1955  ;;  %v618_v0 = vmul.f32 1.442695, %v613_v14  ;;  %v630_v51 = vmul.f32 1.442695, %v625_v29  ;;  %v799_v1 = vsub.f32 %v609_v49, %v2921_v53  ;;  %v811_v4 = vsub.f32 %v2748_v54, %v2921_v53 }
 0x204   :  { %v1958_v5 = vpop.eup %1957  ;;  %v636_v47 = vmul.f32 %v1956_v10, %v2686_v37  ;;  %v644_v17 = vmul.f32 %v1956_v10, %v2692_v41 }
 0x205   :  { %1963 = vpow2.f32 %v618_v0  ;;  %v804_v7 = vmul.f32 1.442695, %v799_v1  ;;  %v648_v12 = vmul.f32 %v1958_v5, %v563_v26  ;;  %v816_v13 = vmul.f32 1.442695, %v811_v4  ;;  %v1960_v52 = vpop.eup %1959  ;;  %v569_v0 = vpop.f32.mrf.mxu2 }
 0x206   :  { %v640_v15 = vadd.f32 %v1958_v5, %v636_v47  ;;  %1965 = vpow2.f32 %v630_v51  ;;  %v602_v46 = vpop.f32.mrf.mxu0  ;;  %v1962_v18 = vpop.eup %1961  ;;  %v834_v23 = vmul.f32 %v1960_v52, %v749_v62 }
 0x207   :  { %1967 = vpow2.f32 %v804_v7  ;;  %v652_v21 = vadd.f32 %v648_v12, %v644_v17  ;;  %v610_v54 = vmax.f32 %v2690_v40, %v602_v46  ;;  %v755_v4 = vpop.f32.mrf.mxu1 }
 0x208   :  { %v822_v57 = vmul.f32 %v1962_v18, %v640_v15  ;;  %1969 = vpow2.f32 %v816_v13 }
 0x209   :  { %v830_v37 = vmul.f32 %v1962_v18, %v652_v21  ;;  %v614_v41 = vsub.f32 %v2690_v40, %v610_v54  ;;  %v626_v33 = vsub.f32 %v602_v46, %v610_v54  ;;  %v2933_v34 = vmax.f32 %v610_v54, %v2787_v48 }
 0x20a   :  { %v2935_v36 = vadd.f32 %v1960_v52, %v822_v57 }
 0x20b   :  { %v1964_v32 = vpop.eup %1963  ;;  %v2937_v3 = vadd.f32 %v834_v23, %v830_v37  ;;  %v620_v59 = vmul.f32 1.442695, %v614_v41  ;;  %v632_v45 = vmul.f32 1.442695, %v626_v33  ;;  %v800_v38 = vsub.f32 %v610_v54, %v2933_v34 }
 0x20c   :  { %v1966_v22 = vpop.eup %1965  ;;  %v637_v24 = vmul.f32 %v1964_v32, %v2697_v55  ;;  %v645_v27 = vmul.f32 %v1964_v32, %v2701_v63  ;;  %v812_v40 = vsub.f32 %v2787_v48, %v2933_v34 }
 0x20d   :  { %v1968_v25 = vpop.eup %1967  ;;  %1971 = vpow2.f32 %v620_v59  ;;  %v806_v26 = vmul.f32 1.442695, %v800_v38  ;;  %v649_v9 = vmul.f32 %v1966_v22, %v566_v16 }
 0x20e   :  { %v1970_v43 = vpop.eup %1969  ;;  %v641_v8 = vadd.f32 %v1966_v22, %v637_v24  ;;  %1973 = vpow2.f32 %v632_v45  ;;  %v605_v62 = vpop.f32.mrf.mxu0  ;;  %v818_v49 = vmul.f32 1.442695, %v812_v40 }
 0x20f   :  { %1975 = vpow2.f32 %v806_v26  ;;  %v653_v14 = vadd.f32 %v649_v9, %v645_v27  ;;  %v835_v29 = vmul.f32 %v1970_v43, %v752_v30  ;;  %v611_v10 = vmax.f32 %v2699_v58, %v605_v62  ;;  %v758_v27 = vpop.f32.mrf.mxu1 }
 0x210   :  { %v823_v55 = vmul.f32 %v1968_v25, %v641_v8  ;;  %1977 = vpow2.f32 %v818_v49 }
 0x211   :  { %v831_v63 = vmul.f32 %v1968_v25, %v653_v14  ;;  %v615_v48 = vsub.f32 %v2699_v58, %v611_v10  ;;  %v627_v51 = vsub.f32 %v605_v62, %v611_v10  ;;  %v2947_v1 = vmax.f32 %v611_v10, %v2796_v35 }
 0x212   :  { %v2949_v5 = vadd.f32 %v1970_v43, %v823_v55  ;;  %v1224_v55 = vld [vmem:[%s3287_s1 + $0x56] sm:$0x1] }
 0x213   :  { %v1972_v47 = vpop.eup %1971  ;;  %v2951_v17 = vadd.f32 %v835_v29, %v831_v63  ;;  %v622_v7 = vmul.f32 1.442695, %v615_v48  ;;  %v634_v12 = vmul.f32 1.442695, %v627_v51  ;;  %v801_v13 = vsub.f32 %v611_v10, %v2947_v1  ;;  %v1222_v63 = vld [vmem:[%s3287_s1 + $0x46] sm:$0x1] }
 0x214   :  { %v1974_v52 = vpop.eup %1973  ;;  %v638_v15 = vmul.f32 %v1972_v47, %v2706_v6  ;;  %v646_v46 = vmul.f32 %v1972_v47, %v2710_v11  ;;  %v813_v58 = vsub.f32 %v2796_v35, %v2947_v1  ;;  %v457_v11 = vadd.f32 %v2730_v31, %v2724_v20  ;;  %v572_v35 = vpop.f32.mrf.mxu2  ;;  %v1225_v48 = vld [vmem:[%s3287_s1 + $0x5e] sm:$0x1] }
 0x215   :  { %v1976_v16 = vpop.eup %1975  ;;  %1979 = vpow2.f32 %v622_v7  ;;  %v808_v18 = vmul.f32 1.442695, %v801_v13  ;;  %v650_v21 = vmul.f32 %v1974_v52, %v569_v0  ;;  %v1262_v51 = vrot.slane %v1224_v55, 6 }
 0x216   :  { %v1978_v23 = vpop.eup %1977  ;;  %v642_v54 = vadd.f32 %v1974_v52, %v638_v15  ;;  %1981 = vpow2.f32 %v634_v12  ;;  %v2958_v57 = vpop.f32.mrf.mxu0  ;;  %v820_v30 = vmul.f32 1.442695, %v813_v58  ;;  %v1264_v7 = vrot.slane %v1225_v48, 5  ;;  %v1227_v12 = vld [vmem:[%s3287_s1 + $0x6e] sm:$0x1] }
 0x217   :  { %v654_v37 = vadd.f32 %v650_v21, %v646_v46  ;;  %v836_v41 = vmul.f32 %v1978_v23, %v755_v4  ;;  %v1226_v4 = vld [vmem:[%s3287_s1 + $0x66] sm:$0x1]  ;;  %v1215_v15 = vld [vmem:[%s3287_s1 + $0xe] sm:$0x1]  ;;  %v1268_v21 = vrot.slane %v1227_v12, 3 }
 0x218   :  { %v824_v33 = vmul.f32 %v1976_v16, %v642_v54  ;;  %1983 = vpow2.f32 %v820_v30  ;;  %v1266_v52 = vrot.slane %v1226_v4, 4  ;;  %v1246_v54 = vrot.slane %v1215_v15, 7 }
 0x219   :  { %1985 = vpow2.f32 %v808_v18  ;;  %v832_v6 = vmul.f32 %v1976_v16, %v654_v37  ;;  %v1228_v16 = vld [vmem:[%s3287_s1 + $0x76] sm:$0x1]  ;;  %v1229_v37 = vld [vmem:[%s3287_s1 + $0x7e] sm:$0x1] }
 0x21a   :  { %v2962_v32 = vadd.f32 %v1978_v23, %v824_v33  ;;  %v1216_v23 = vld [vmem:[%s3287_s1 + $0x16] sm:$0x1]  ;;  %v1270_v33 = vrot.slane %v1228_v16, 2 }
 0x21b   :  { %v1980_v59 = vpop.eup %1979  ;;  %v2964_v45 = vadd.f32 %v836_v41, %v832_v6  ;;  %v1214_v6 = vld [vmem:[%s3287_s1 + $0x6] sm:$0x1] }
 0x21c   :  { %v1982_v38 = vpop.eup %1981  ;;  %v639_v22 = vmul.f32 %v1980_v59, %v457_v11  ;;  %v647_v24 = vmul.f32 %v1980_v59, %v2774_v28  ;;  %v1223_v28 = vld [vmem:[%s3287_s1 + $0x4e] sm:$0x1]  ;;  %v1248_v11 = vrot.slane %v1216_v23, 6  ;;  %v1217_v59 = vld [vmem:[%s3287_s1 + $0x1e] sm:$0x1]  ;;  %v2065_v23 = vld [vmem:[%s3288_s2 + $0x30] sm:$0xff] }
 0x21d   :  { %v651_v40 = vmul.f32 %v1982_v38, %v572_v35  ;;  %v1260_v0 = vrot.slane %v1223_v28, 7 }
 0x21e   :  { %v1984_v25 = vpop.eup %1983  ;;  %v643_v26 = vadd.f32 %v1982_v38, %v639_v22  ;;  %v926_v9 = vpop.f32.mrf.mxu0  ;;  %v1218_v38 = vld [vmem:[%s3287_s1 + $0x26] sm:$0x1]  ;;  %v1247_v22 = vsel %vm140_vm1, %v1246_v54, %v1214_v6  ;;  %v2071_v6 = vld [vmem:[%s3288_s2 + $0x50] sm:$0xff] }
 0x21f   :  { %v1986_v43 = vpop.eup %1985  ;;  %v655_v8 = vadd.f32 %v651_v40, %v647_v24  ;;  %v837_v62 = vmul.f32 %v1984_v25, %v758_v27  ;;  %v1261_v47 = vsel %vm140_vm1, %v1260_v0, %v1222_v63  ;;  %v1219_v27 = vld [vmem:[%s3287_s1 + $0x2e] sm:$0x1]  ;;  %v1220_v40 = vld [vmem:[%s3287_s1 + $0x36] sm:$0x1]  ;;  %v947_v0 = vmul.f32 %v2958_v57, %v2503_v19  ;;  %v3075_v54 = vld [vmem:[%s3288_s2 + $0x80] sm:$0xff] }
 0x220   :  { %v825_v49 = vmul.f32 %v1986_v43, %v643_v26  ;;  %v1263_v13 = vsel %vm143_vm2, %v1262_v51, %v1261_v47  ;;  %v1272_v26 = vrot.slane %v1229_v37, 1  ;;  %v1256_v28 = vrot.slane %v1220_v40, 2  ;;  %v3086_v37 = vld [vmem:[%s3288_s2 + $0x88] sm:$0xff] }
 0x221   :  { %v833_v20 = vmul.f32 %v1986_v43, %v655_v8  ;;  %v1265_v18 = vsel %vm146_vm3, %v1264_v7, %v1263_v13  ;;  %v1250_v43 = vrot.slane %v1217_v59, 5  ;;  %v1252_v8 = vrot.slane %v1218_v38, 4 }
 0x222   :  { %v2967_v31 = vadd.f32 %v1984_v25, %v825_v49  ;;  %v1267_v41 = vsel %vm149_vm4, %v1266_v52, %v1265_v18  ;;  %v1249_v25 = vsel %vm143_vm2, %v1248_v11, %v1247_v22  ;;  %v948_v49 = vmul.f32 %v926_v9, %v2482_v2  ;;  %v2063_v52 = vld [vmem:[%s3288_s2 + $0x20] sm:$0xff]  ;;  %v2072_v11 = vld [vmem:[%s3288_s2 + $0x58] sm:$0xff] }
 0x223   :  { %v2969_v14 = vadd.f32 %v837_v62, %v833_v20  ;;  %v1269_v35 = vsel %vm152_vm5, %v1268_v21, %v1267_v41  ;;  %v1254_v62 = vrot.slane %v1219_v27, 3  ;;  %v1251_v55 = vsel %vm146_vm3, %v1250_v43, %v1249_v25  ;;  %v2069_v41 = vld [vmem:[%s3288_s2 + $0x40] sm:$0xff] }
 0x224   :  { %v1271_v20 = vsel %vm155_vm6, %v1270_v33, %v1269_v35  ;;  %v1253_v63 = vsel %vm149_vm4, %v1252_v8, %v1251_v55  ;;  %v2070_v33 = vld [vmem:[%s3288_s2 + $0x48] sm:$0xff] }
 0x225   :  { %v1273_v9 = vsel %vm158_vm7, %v1272_v26, %v1271_v20  ;;  %v1255_v51 = vsel %vm152_vm5, %v1254_v62, %v1253_v63 }
 0x226   :  { %v929_v29 = vpop.f32.mrf.mxu0  ;;  %v2971_v10 = vpop.f32.mrf.mxu1  ;;  %v1257_v47 = vsel %vm155_vm6, %v1256_v28, %v1255_v51 }
 0x227   :  { %v949_v24 = vmul.f32 %v929_v29, %v2474_v60  ;;  %v1221_v29 = vld [vmem:[%s3287_s1 + $0x3e] sm:$0x1] }
 0x228   :  { %v1258_v4 = vrot.slane %v1221_v29, 1 }
 0x22a   :  { %v1259_v57 = vsel %vm158_vm7, %v1258_v4, %v1257_v47 }
 0x22e   :  { %v932_v46 = vpop.f32.mrf.mxu0  ;;  %v2996_v58 = vpop.f32.mrf.mxu1 }
 0x22f   :  { %v950_v30 = vmul.f32 %v932_v46, %v2476_v61 }
 0x231   :  { %963 = vmatpush.msrb.mxu2 %v950_v30  ;;  %v2067_v30 = vld [vmem:[%s3288_s2 + $0x38] sm:$0xff] }
 0x233   :  { %964 = vmatpush.msrb.mxu2 %v949_v24 }
 0x235   :  { %965 = vmatpush.msrb.mxu2 %v948_v49 }
 0x236   :  { %v3038_v48 = vpop.f32.mrf.mxu1  ;;  %v935_v25 = vpop.f32.mrf.mxu0 }
 0x237   :  { %966 = vmatpush.msrb.mxu2 %v947_v0 }
 0x238   :  { %1864 = vmatmul.msk.f32.vlgmr.msrb.gmra.mxu2 %vm65_vm0, %v2519_v39 }
 0x239   :  { %1882 = vmatpush.xpose.msk.msra.mxu2 %vm65_vm0, %v1273_v9 }
 0x23d   :  { %1883 = vmatpush.xpose.msk.msra.mxu2 %vm65_vm0, %v1259_v57 }
 0x23e   :  { %v3048_v7 = vpop.f32.mrf.mxu1 }
 0x240   :  { %1865 = vmatmul.msk.f32.gmra.mxu2 %vm65_vm0, %v2532_v44  ;;  %v2064_v44 = vld [vmem:[%s3288_s2 + $0x28] sm:$0xff] }
 0x246   :  { %v1481_v12 = vpop.f32.mrf.mxu1 }
 0x247   :  { %v1505_v21 = vmul.f32 %v1481_v12, %v2503_v19 }
 0x248   :  { %1866 = vmatmul.msk.f32.gmra.mxu2 %vm65_vm0, %v2543_v50 }
 0x24e   :  { %v1484_v13 = vpop.f32.mrf.mxu1 }
 0x24f   :  { %v1506_v18 = vmul.f32 %v1484_v13, %v2482_v2 }
 0x250   :  { %1867 = vmatmul.msk.f32.gmra.mxu2 %vm65_vm0, %v2556_v56 }
 0x256   :  { %v1487_v39 = vpop.f32.mrf.mxu1 }
 0x257   :  { %v1507_v16 = vmul.f32 %v1487_v39, %v2474_v60 }
 0x258   :  { %1884 = vmatmul.msk.f32.vlgmr.msra.gmra.mxu2 %vm65_vm0, %v2063_v52  ;;  %v938_v52 = vpop.f32.mrf.mxu0 }
 0x25e   :  { %v1490_v15 = vpop.f32.mrf.mxu1 }
 0x25f   :  { %v1508_v46 = vmul.f32 %v1490_v15, %v2476_v61 }
 0x260   :  { %1885 = vmatmul.msk.f32.gmra.mxu2 %vm65_vm0, %v2064_v44 }
 0x261   :  { %1521 = vmatpush.msra.mxu3 %v1508_v46 }
 0x263   :  { %1522 = vmatpush.msra.mxu3 %v1507_v16 }
 0x265   :  { %1523 = vmatpush.msra.mxu3 %v1506_v18 }
 0x267   :  { %1524 = vmatpush.msra.mxu3 %v1505_v21 }
 0x268   :  { %1886 = vmatmul.msk.f32.gmra.mxu2 %vm65_vm0, %v2065_v23  ;;  %1906 = vmatmul.msk.f32.vlgmr.msra.gmra.mxu3 %vm65_vm0, %v3075_v54 }
 0x270   :  { %1887 = vmatmul.msk.f32.gmra.mxu2 %vm65_vm0, %v2067_v30  ;;  %1907 = vmatmul.msk.f32.gmra.mxu3 %vm65_vm0, %v3086_v37 }
 0x278   :  { %1888 = vmatmul.msk.f32.gmra.mxu2 %vm65_vm0, %v2069_v41  ;;  %1908 = vmatmul.msk.f32.gmra.mxu3 %vm65_vm0, %v2543_v50 }
 0x280   :  { %1889 = vmatmul.msk.f32.gmra.mxu2 %vm65_vm0, %v2070_v33  ;;  %1909 = vmatmul.msk.f32.gmra.mxu3 %vm65_vm0, %v2556_v56 }
 0x288   :  { %1890 = vmatmul.msk.f32.gmra.mxu2 %vm65_vm0, %v2071_v6 }
 0x290   :  { %1891 = vmatmul.msk.f32.gmra.mxu2 %vm65_vm0, %v2072_v11 }
 0x2bb   :  { %v968_v50 = vpop.f32.mrf.mxu2 }
 0x2bc   :  { %v980_v35 = vmax.f32 %v2911_v42, %v968_v50 }
 0x2be   :  { %v984_v59 = vsub.f32 %v2911_v42, %v980_v35  ;;  %v996_v38 = vsub.f32 %v968_v50, %v980_v35  ;;  %v3113_v56 = vmax.f32 %v980_v35, %v2971_v10  ;;  %v1121_v42 = vpop.f32.mrf.mxu3 }
 0x2c0   :  { %v988_v22 = vmul.f32 1.442695, %v984_v59  ;;  %v1000_v24 = vmul.f32 1.442695, %v996_v38  ;;  %v1170_v27 = vsub.f32 %v980_v35, %v3113_v56  ;;  %v1182_v40 = vsub.f32 %v2971_v10, %v3113_v56 }
 0x2c2   :  { %1987 = vpow2.f32 %v988_v22  ;;  %v1174_v26 = vmul.f32 1.442695, %v1170_v27  ;;  %v1186_v43 = vmul.f32 1.442695, %v1182_v40 }
 0x2c3   :  { %1989 = vpow2.f32 %v1000_v24  ;;  %v971_v8 = vpop.f32.mrf.mxu2 }
 0x2c4   :  { %v981_v62 = vmax.f32 %v2921_v53, %v971_v8  ;;  %1991 = vpow2.f32 %v1186_v43 }
 0x2c5   :  { %1993 = vpow2.f32 %v1174_v26 }
 0x2c6   :  { %v985_v49 = vsub.f32 %v2921_v53, %v981_v62  ;;  %v997_v20 = vsub.f32 %v971_v8, %v981_v62  ;;  %v3121_v29 = vmax.f32 %v981_v62, %v2996_v58  ;;  %v1124_v23 = vpop.f32.mrf.mxu3 }
 0x2c8   :  { %v1988_v28 = vpop.eup %1987  ;;  %v990_v55 = vmul.f32 1.442695, %v985_v49  ;;  %v1002_v10 = vmul.f32 1.442695, %v997_v20  ;;  %v1171_v0 = vsub.f32 %v981_v62, %v3121_v29  ;;  %v1183_v63 = vsub.f32 %v2996_v58, %v3121_v29  ;;  %v941_v49 = vpop.f32.mrf.mxu0 }
 0x2c9   :  { %v1990_v9 = vpop.eup %1989  ;;  %v1008_v51 = vmul.f32 %v1988_v28, %v2935_v36  ;;  %v1016_v4 = vmul.f32 %v1988_v28, %v2937_v3 }
 0x2ca   :  { %1995 = vpow2.f32 %v990_v55  ;;  %v1176_v47 = vmul.f32 1.442695, %v1171_v0  ;;  %v1020_v53 = vmul.f32 %v1990_v9, %v935_v25  ;;  %v1188_v57 = vmul.f32 1.442695, %v1183_v63  ;;  %v1992_v12 = vpop.eup %1991 }
 0x2cb   :  { %v1012_v13 = vadd.f32 %v1990_v9, %v1008_v51  ;;  %1997 = vpow2.f32 %v1002_v10  ;;  %v974_v39 = vpop.f32.mrf.mxu2  ;;  %v1994_v15 = vpop.eup %1993  ;;  %v1206_v44 = vmul.f32 %v1992_v12, %v1121_v42 }
 0x2cc   :  { %1999 = vpow2.f32 %v1176_v47  ;;  %v1024_v46 = vadd.f32 %v1020_v53, %v1016_v4  ;;  %v982_v58 = vmax.f32 %v2933_v34, %v974_v39 }
 0x2cd   :  { %v1194_v16 = vmul.f32 %v1994_v15, %v1012_v13  ;;  %2001 = vpow2.f32 %v1188_v57 }
 0x2ce   :  { %v1202_v36 = vmul.f32 %v1994_v15, %v1024_v46  ;;  %v986_v3 = vsub.f32 %v2933_v34, %v982_v58  ;;  %v998_v18 = vsub.f32 %v974_v39, %v982_v58  ;;  %v3131_v21 = vmax.f32 %v982_v58, %v3038_v48  ;;  %v1127_v57 = vpop.f32.mrf.mxu3 }
 0x2cf   :  { %v3133_v30 = vadd.f32 %v1992_v12, %v1194_v16 }
 0x2d0   :  { %v1996_v41 = vpop.eup %1995  ;;  %v3135_v33 = vadd.f32 %v1206_v44, %v1202_v36  ;;  %v992_v6 = vmul.f32 1.442695, %v986_v3  ;;  %v1004_v11 = vmul.f32 1.442695, %v998_v18  ;;  %v1172_v50 = vsub.f32 %v982_v58, %v3131_v21 }
 0x2d1   :  { %v1998_v35 = vpop.eup %1997  ;;  %v1009_v59 = vmul.f32 %v1996_v41, %v2949_v5  ;;  %v1017_v38 = vmul.f32 %v1996_v41, %v2951_v17  ;;  %v1184_v34 = vsub.f32 %v3038_v48, %v3131_v21 }
 0x2d2   :  { %v2000_v22 = vpop.eup %1999  ;;  %2003 = vpow2.f32 %v992_v6  ;;  %v1178_v24 = vmul.f32 1.442695, %v1172_v50  ;;  %v1021_v27 = vmul.f32 %v1998_v35, %v938_v52 }
 0x2d3   :  { %v2002_v40 = vpop.eup %2001  ;;  %v1013_v25 = vadd.f32 %v1998_v35, %v1009_v59  ;;  %2005 = vpow2.f32 %v1004_v11  ;;  %v977_v26 = vpop.f32.mrf.mxu2  ;;  %v1190_v43 = vmul.f32 1.442695, %v1184_v34 }
 0x2d4   :  { %2007 = vpow2.f32 %v1178_v24  ;;  %v1025_v8 = vadd.f32 %v1021_v27, %v1017_v38  ;;  %v1207_v62 = vmul.f32 %v2002_v40, %v1124_v23  ;;  %v983_v42 = vmax.f32 %v2947_v1, %v977_v26 }
 0x2d5   :  { %v1195_v5 = vmul.f32 %v2000_v22, %v1013_v25  ;;  %2009 = vpow2.f32 %v1190_v43 }
 0x2d6   :  { %v1203_v17 = vmul.f32 %v2000_v22, %v1025_v8  ;;  %v987_v48 = vsub.f32 %v2947_v1, %v983_v42  ;;  %v999_v20 = vsub.f32 %v977_v26, %v983_v42  ;;  %v3145_v28 = vmax.f32 %v983_v42, %v3048_v7  ;;  %v1130_v59 = vpop.f32.mrf.mxu3 }
 0x2d7   :  { %v3147_v55 = vadd.f32 %v2002_v40, %v1195_v5 }
 0x2d8   :  { %v2004_v10 = vpop.eup %2003  ;;  %v3149_v0 = vadd.f32 %v1207_v62, %v1203_v17  ;;  %v994_v63 = vmul.f32 1.442695, %v987_v48  ;;  %v1006_v9 = vmul.f32 1.442695, %v999_v20  ;;  %v1173_v51 = vsub.f32 %v983_v42, %v3145_v28  ;;  %v3171_v42 = vld [vmem:[%s3289_s3] sm:$0xff] }
 0x2d9   :  { %v2006_v4 = vpop.eup %2005  ;;  %v1010_v47 = vmul.f32 %v2004_v10, %v2962_v32  ;;  %v1018_v53 = vmul.f32 %v2004_v10, %v2964_v45  ;;  %v1185_v1 = vsub.f32 %v3048_v7, %v3145_v28  ;;  %v944_v45 = vpop.f32.mrf.mxu0  ;;  %v2084_v62 = vmov 1  }
 0x2da   :  { %v2008_v12 = vpop.eup %2007  ;;  %2011 = vpow2.f32 %v994_v63  ;;  %v1180_v13 = vmul.f32 1.442695, %v1173_v51  ;;  %v1022_v39 = vmul.f32 %v2006_v4, %v941_v49  ;;  %1930 = vset.pattern.permute.xlu1 %v2084_v62  ;;  %1929 = vset.pattern.permute.xlu0 %v2084_v62  ;;  %v3185_v49 = vld [vmem:[%s3289_s3 + $0x18] sm:$0xff] }
 0x2db   :  { %v2010_v52 = vpop.eup %2009  ;;  %v1014_v15 = vadd.f32 %v2006_v4, %v1010_v47  ;;  %2013 = vpow2.f32 %v1006_v9  ;;  %v1295_v46 = vpop.f32.mrf.mxu2  ;;  %v1192_v44 = vmul.f32 1.442695, %v1185_v1  ;;  %1607 = vperm.xlu1 %1930, %v3171_v42   ;;  %1928 = vset.pattern.permute.xlu2 %v2084_v62 }
 0x2dc   :  { %v1026_v58 = vadd.f32 %v1022_v39, %v1018_v53  ;;  %v1208_v36 = vmul.f32 %v2010_v52, %v1127_v57  ;;  %1619 = vperm.xlu2 %1928, %v3185_v49  }
 0x2dd   :  { %v1196_v16 = vmul.f32 %v2008_v12, %v1014_v15  ;;  %2015 = vpow2.f32 %v1192_v44 }
 0x2de   :  { %2017 = vpow2.f32 %v1180_v13  ;;  %v1204_v32 = vmul.f32 %v2008_v12, %v1026_v58 }
 0x2df   :  { %v3156_v3 = vadd.f32 %v2010_v52, %v1196_v16  ;;  %v1493_v52 = vpop.f32.mrf.mxu1 }
 0x2e0   :  { %v2012_v18 = vpop.eup %2011  ;;  %v3158_v7 = vadd.f32 %v1208_v36, %v1204_v32 }
 0x2e1   :  { %v2014_v23 = vpop.eup %2013  ;;  %v1011_v41 = vmul.f32 %v2012_v18, %v2967_v31  ;;  %v1019_v6 = vmul.f32 %v2012_v18, %v2969_v14 }
 0x2e2   :  { %v1023_v11 = vmul.f32 %v2014_v23, %v944_v45 }
 0x2e3   :  { %v2016_v50 = vpop.eup %2015  ;;  %v1015_v35 = vadd.f32 %v2014_v23, %v1011_v41  ;;  %v1298_v38 = vpop.f32.mrf.mxu2 }
 0x2e4   :  { %v2018_v34 = vpop.eup %2017  ;;  %v1027_v22 = vadd.f32 %v1023_v11, %v1019_v6  ;;  %v1209_v40 = vmul.f32 %v2016_v50, %v1130_v59  ;;  %v1320_v5 = vmul.f32 %v1298_v38, %v2482_v2  ;;  %v3193_v2 = vld [vmem:[%s3289_s3 + $0x10] sm:$0xff] }
 0x2e5   :  { %v1197_v24 = vmul.f32 %v2018_v34, %v1015_v35  ;;  %1615 = vperm.xlu2 %1928, %v3193_v2  }
 0x2e6   :  { %v1205_v27 = vmul.f32 %v2018_v34, %v1027_v22 }
 0x2e7   :  { %v3162_v25 = vadd.f32 %v2016_v50, %v1197_v24 }
 0x2e8   :  { %v3164_v26 = vadd.f32 %v1209_v40, %v1205_v27 }
 0x2eb   :  { %v1301_v43 = vpop.f32.mrf.mxu2  ;;  %v1526_v17 = vpop.f32.mrf.mxu3 }
 0x2ec   :  { %v1321_v14 = vmul.f32 %v1301_v43, %v2474_v60  ;;  %v1319_v60 = vmul.f32 %v1295_v46, %v2503_v19  ;;  %v2077_v19 = vld [vmem:[%s3288_s2 + $0x90] sm:$0xff] }
 0x2f3   :  { %v1304_v8 = vpop.f32.mrf.mxu2  ;;  %v1529_v9 = vpop.f32.mrf.mxu3 }
 0x2f4   :  { %v1322_v31 = vmul.f32 %v1304_v8, %v2476_v61  ;;  %v3178_v61 = vld [vmem:[%s3289_s3 + $0x8] sm:$0xff] }
 0x2f5   :  { %1611 = vperm.xlu0 %1929, %v3178_v61  }
 0x2f6   :  { %1335 = vmatpush.msra.mxu0 %v1322_v31  ;;  %v1496_v31 = vpop.f32.mrf.mxu1 }
 0x2f8   :  { %1336 = vmatpush.msra.mxu0 %v1321_v14 }
 0x2fa   :  { %1337 = vmatpush.msra.mxu0 %v1320_v5 }
 0x2fb   :  { %v1307_v57 = vpop.f32.mrf.mxu2  ;;  %v1532_v41 = vpop.f32.mrf.mxu3 }
 0x2fc   :  { %1338 = vmatpush.msra.mxu0 %v1319_v60 }
 0x2fd   :  { %1892 = vmatmul.msk.f32.vlgmr.msra.gmra.mxu0 %vm65_vm0, %v3075_v54  ;;  %v2078_v54 = vld [vmem:[%s3288_s2 + $0x98] sm:$0xff] }
 0x303   :  { %v1310_v38 = vpop.f32.mrf.mxu2 }
 0x305   :  { %1893 = vmatmul.msk.f32.gmra.mxu0 %vm65_vm0, %v3086_v37 }
 0x30d   :  { %1894 = vmatmul.msk.f32.gmra.mxu0 %vm65_vm0, %v2077_v19 }
 0x315   :  { %1895 = vmatmul.msk.f32.gmra.mxu0 %vm65_vm0, %v2078_v54 }
 0x37a   :  { %v1340_v48 = vpop.f32.mrf.mxu0 }
 0x37b   :  { %v1352_v20 = vmax.f32 %v3113_v56, %v1340_v48 }
 0x37d   :  { %v1356_v10 = vsub.f32 %v3113_v56, %v1352_v20  ;;  %v1368_v63 = vsub.f32 %v1340_v48, %v1352_v20  ;;  %v1538_v37 = vmax.f32 %v1352_v20, %v1526_v17 }
 0x37f   :  { %v1360_v51 = vmul.f32 1.442695, %v1356_v10  ;;  %v1372_v4 = vmul.f32 1.442695, %v1368_v63  ;;  %v1542_v47 = vsub.f32 %v1352_v20, %v1538_v37  ;;  %v1554_v53 = vsub.f32 %v1526_v17, %v1538_v37 }
 0x381   :  { %2019 = vpow2.f32 %v1360_v51  ;;  %v1546_v1 = vmul.f32 1.442695, %v1542_v47  ;;  %v1558_v12 = vmul.f32 1.442695, %v1554_v53  ;;  %v1535_v53 = vpop.f32.mrf.mxu3 }
 0x382   :  { %2021 = vpow2.f32 %v1372_v4  ;;  %v1343_v13 = vpop.f32.mrf.mxu0 }
 0x383   :  { %v1353_v39 = vmax.f32 %v3121_v29, %v1343_v13  ;;  %2023 = vpow2.f32 %v1558_v12  ;;  %v1313_v12 = vpop.f32.mrf.mxu2 }
 0x384   :  { %2025 = vpow2.f32 %v1546_v1 }
 0x385   :  { %v1357_v56 = vsub.f32 %v3121_v29, %v1353_v39  ;;  %v1369_v15 = vsub.f32 %v1343_v13, %v1353_v39  ;;  %v1539_v46 = vmax.f32 %v1353_v39, %v1529_v9 }
 0x387   :  { %v2020_v44 = vpop.eup %2019  ;;  %v1362_v58 = vmul.f32 1.442695, %v1357_v56  ;;  %v1374_v16 = vmul.f32 1.442695, %v1369_v15  ;;  %v1543_v32 = vsub.f32 %v1353_v39, %v1539_v46  ;;  %v1555_v36 = vsub.f32 %v1529_v9, %v1539_v46 }
 0x388   :  { %v2022_v45 = vpop.eup %2021  ;;  %v1380_v18 = vmul.f32 %v2020_v44, %v3133_v30  ;;  %v1388_v23 = vmul.f32 %v2020_v44, %v3135_v33 }
 0x389   :  { %2027 = vpow2.f32 %v1362_v58  ;;  %v1548_v6 = vmul.f32 1.442695, %v1543_v32  ;;  %v1560_v11 = vmul.f32 1.442695, %v1555_v36  ;;  %v1392_v50 = vmul.f32 %v2022_v45, %v1307_v57  ;;  %v2024_v35 = vpop.eup %2023 }
 0x38a   :  { %v1384_v59 = vadd.f32 %v2022_v45, %v1380_v18  ;;  %2029 = vpow2.f32 %v1374_v16  ;;  %v1346_v29 = vpop.f32.mrf.mxu0  ;;  %v2026_v34 = vpop.eup %2025  ;;  %v1578_v27 = vmul.f32 %v2024_v35, %v1493_v52 }
 0x38b   :  { %2031 = vpow2.f32 %v1548_v6  ;;  %v1396_v22 = vadd.f32 %v1392_v50, %v1388_v23  ;;  %v1354_v24 = vmax.f32 %v3131_v21, %v1346_v29  ;;  %v1499_v6 = vpop.f32.mrf.mxu1 }
 0x38c   :  { %2033 = vpow2.f32 %v1560_v11  ;;  %v1566_v30 = vmul.f32 %v2026_v34, %v1384_v59 }
 0x38d   :  { %v1574_v40 = vmul.f32 %v2026_v34, %v1396_v22  ;;  %v1358_v33 = vsub.f32 %v3131_v21, %v1354_v24  ;;  %v1370_v43 = vsub.f32 %v1346_v29, %v1354_v24  ;;  %v1540_v8 = vmax.f32 %v1354_v24, %v1532_v41 }
 0x38e   :  { %v1570_v14 = vadd.f32 %v2024_v35, %v1566_v30 }
 0x38f   :  { %v2028_v62 = vpop.eup %2027  ;;  %v1582_v5 = vadd.f32 %v1578_v27, %v1574_v40  ;;  %v1364_v60 = vmul.f32 1.442695, %v1358_v33  ;;  %v1376_v19 = vmul.f32 1.442695, %v1370_v43  ;;  %v1544_v54 = vsub.f32 %v1354_v24, %v1540_v8  ;;  %v1316_v40 = vpop.f32.mrf.mxu2 }
 0x390   :  { %v2030_v17 = vpop.eup %2029  ;;  %v1381_v48 = vmul.f32 %v2028_v62, %v3147_v55  ;;  %v1556_v20 = vsub.f32 %v1532_v41, %v1540_v8  ;;  %v1389_v10 = vmul.f32 %v2028_v62, %v3149_v0  ;;  %2035 = vrcp.f32 %v1570_v14 }
 0x391   :  { %v2032_v63 = vpop.eup %2031  ;;  %2037 = vpow2.f32 %v1364_v60  ;;  %v1550_v37 = vmul.f32 1.442695, %v1544_v54  ;;  %v1393_v21 = vmul.f32 %v2030_v17, %v1310_v38 }
 0x392   :  { %v2034_v9 = vpop.eup %2033  ;;  %v1385_v51 = vadd.f32 %v2030_v17, %v1381_v48  ;;  %2039 = vpow2.f32 %v1376_v19  ;;  %v1562_v4 = vmul.f32 1.442695, %v1556_v20  ;;  %v1349_v47 = vpop.f32.mrf.mxu0 }
 0x393   :  { %2041 = vpow2.f32 %v1550_v37  ;;  %v1397_v57 = vadd.f32 %v1393_v21, %v1389_v10  ;;  %v1355_v1 = vmax.f32 %v3145_v28, %v1349_v47  ;;  %v1579_v55 = vmul.f32 %v2034_v9, %v1496_v31  ;;  %v1502_v48 = vpop.f32.mrf.mxu1 }
 0x394   :  { %2043 = vpow2.f32 %v1562_v4  ;;  %v1567_v13 = vmul.f32 %v2032_v63, %v1385_v51 }
 0x395   :  { %v1575_v0 = vmul.f32 %v2032_v63, %v1397_v57  ;;  %v1359_v39 = vsub.f32 %v3145_v28, %v1355_v1  ;;  %v1371_v52 = vsub.f32 %v1349_v47, %v1355_v1  ;;  %v1541_v56 = vmax.f32 %v1355_v1, %v1535_v53 }
 0x396   :  { %v2036_v15 = vpop.eup %2035  ;;  %v1571_v46 = vadd.f32 %v2034_v9, %v1567_v13 }
 0x397   :  { %v2038_v44 = vpop.eup %2037  ;;  %v1583_v58 = vadd.f32 %v1579_v55, %v1575_v0  ;;  %v1366_v16 = vmul.f32 1.442695, %v1359_v39  ;;  %v1378_v32 = vmul.f32 1.442695, %v1371_v52  ;;  %v1545_v36 = vsub.f32 %v1355_v1, %v1541_v56  ;;  %v1620_v55 = vpop.permute.xlu2 %1619 }
 0x398   :  { %v2040_v45 = vpop.eup %2039  ;;  %v1382_v18 = vmul.f32 %v2038_v44, %v3156_v3  ;;  %v1557_v23 = vsub.f32 %v1535_v53, %v1541_v56  ;;  %v1390_v41 = vmul.f32 %v2038_v44, %v3158_v7  ;;  %v1590_v11 = vmul.f32 %v2036_v15, %v1570_v14 }
 0x399   :  { %v2042_v50 = vpop.eup %2041  ;;  %2045 = vpow2.f32 %v1366_v16  ;;  %v1552_v28 = vmul.f32 1.442695, %v1545_v36  ;;  %v1394_v35 = vmul.f32 %v2040_v45, %v1313_v12  ;;  %v2085_v44 = vmov 2   ;;  %v1612_v16 = vpop.permute.xlu0 %1611 }
 0x39a   :  { %v2044_v59 = vpop.eup %2043  ;;  %v1386_v29 = vadd.f32 %v2040_v45, %v1382_v18  ;;  %2047 = vpow2.f32 %v1378_v32  ;;  %v1564_v38 = vmul.f32 1.442695, %v1557_v23  ;;  %v1594_v34 = vsub.f32 2.0, %v1590_v11  ;;  %1932 = vset.pattern.permute.xlu1 %v2085_v44  ;;  %1933 = vset.pattern.permute.xlu0 %v2085_v44  ;;  %v29_v18 = vld [vmem:[%s3288_s2 + $0x60] sm:$0xff]  ;;  %v31_v11 = vld [vmem:[%s3288_s2 + $0x70] sm:$0xff] }
 0x39b   :  { %2049 = vpow2.f32 %v1552_v28  ;;  %v1398_v22 = vadd.f32 %v1394_v35, %v1390_v41  ;;  %v1580_v30 = vmul.f32 %v2044_v59, %v1499_v6  ;;  %1631 = vperm.xlu1 %1932, %v3178_v61   ;;  %1639 = vperm.xlu0 %1933, %v3185_v49   ;;  %v2086_v23 = vmov 3   ;;  %v30_v6 = vld [vmem:[%s3288_s2 + $0x68] sm:$0xff] }
 0x39c   :  { %2051 = vpow2.f32 %v1564_v38  ;;  %v1598_v24 = vmul.f32 %v2036_v15, %v1594_v34  ;;  %v1568_v27 = vmul.f32 %v2042_v50, %v1386_v29  ;;  %1931 = vset.pattern.permute.xlu2 %v2085_v44  ;;  %v2087_v41 = vmov 4  }
 0x39d   :  { %v1576_v3 = vmul.f32 %v2042_v50, %v1398_v22  ;;  %2053 = vrcp.f32 %v1571_v46  ;;  %1627 = vperm.xlu2 %1931, %v3171_v42   ;;  %v2088_v34 = vmov 32.0  }
 0x39e   :  { %v1602_v7 = vmul.f32 %v1598_v24, %v1582_v5  ;;  %v1572_v33 = vadd.f32 %v2044_v59, %v1568_v27  ;;  %v2079_v27 = vld [vmem:[%s3286_s0 + $0x8] sm:$0xff] }
 0x39f   :  { %v2046_v43 = vpop.eup %2045  ;;  %v1584_v8 = vadd.f32 %v1580_v30, %v1576_v3  ;;  %v1616_v15 = vpop.permute.xlu2 %1615  ;;  %v2081_v30 = vld [vmem:[%s3286_s0 + $0x10] sm:$0xff] }
 0x3a0   :  { %v2048_v31 = vpop.eup %2047  ;;  %v1383_v14 = vmul.f32 %v2046_v43, %v3162_v25  ;;  %v1391_v62 = vmul.f32 %v2046_v43, %v3164_v26  ;;  %2055 = vrcp.f32 %v1572_v33 }
 0x3a1   :  { %v2050_v60 = vpop.eup %2049  ;;  %v1395_v19 = vmul.f32 %v2048_v31, %v1316_v40 }
 0x3a2   :  { %v2052_v54 = vpop.eup %2051  ;;  %v1387_v17 = vadd.f32 %v2048_v31, %v1383_v14 }
 0x3a3   :  { %v2054_v20 = vpop.eup %2053  ;;  %v1399_v10 = vadd.f32 %v1395_v19, %v1391_v62  ;;  %v1581_v21 = vmul.f32 %v2052_v54, %v1502_v48  ;;  %1934 = vset.pattern.permute.xlu1 %v2086_v23  ;;  %1936 = vset.pattern.permute.xlu0 %v2087_v41 }
 0x3a4   :  { %v1569_v63 = vmul.f32 %v2050_v60, %v1387_v17  ;;  %v1591_v37 = vmul.f32 %v2054_v20, %v1571_v46  ;;  %1747 = vperm.xlu1 %1934, %v3171_v42   ;;  %1767 = vperm.xlu0 %1936, %v3171_v42   ;;  %v32_v42 = vld [vmem:[%s3288_s2 + $0x78] sm:$0xff] }
 0x3a5   :  { %v1577_v5 = vmul.f32 %v2050_v60, %v1399_v10  ;;  %1635 = vperm.xlu2 %1931, %v3193_v2  }
 0x3a6   :  { %v2056_v9 = vpop.eup %2055  ;;  %v1573_v51 = vadd.f32 %v2052_v54, %v1569_v63  ;;  %v1595_v4 = vsub.f32 2.0, %v1591_v37  ;;  %v2082_v54 = vld [vmem:[%s3286_s0 + $0x18] sm:$0xff] }
 0x3a7   :  { %v1585_v47 = vadd.f32 %v1581_v21, %v1577_v5  ;;  %v1592_v53 = vmul.f32 %v2056_v9, %v1572_v33 }
 0x3a8   :  { %2057 = vrcp.f32 %v1573_v51  ;;  %v1599_v25 = vmul.f32 %v2054_v20, %v1595_v4 }
 0x3a9   :  { %v1596_v26 = vsub.f32 2.0, %v1592_v53  ;;  %2059 = vrcp.f32 %v2088_v34 }
 0x3aa   :  { %v1603_v57 = vmul.f32 %v1599_v25, %v1583_v58  ;;  %v1608_v58 = vpop.permute.xlu1 %1607 }
 0x3ab   :  { %v1600_v1 = vmul.f32 %v2056_v9, %v1596_v26  ;;  %v1622_v45 = vadd.f32 %v1608_v58, %v1602_v7 }
 0x3ac   :  { %v1623_v36 = vadd.f32 %v1612_v16, %v1603_v57  ;;  %1755 = vperm.xlu1 %1934, %v3193_v2  }
 0x3ad   :  { %v1604_v12 = vmul.f32 %v1600_v1, %v1584_v8  ;;  %1935 = vset.pattern.permute.xlu2 %v2086_v23 }
 0x3ae   :  { %v2058_v13 = vpop.eup %2057  ;;  %1751 = vperm.xlu2 %1935, %v3178_v61  }
 0x3af   :  { %v1593_v0 = vmul.f32 %v2058_v13, %v1573_v51  ;;  %v1624_v32 = vadd.f32 %v1616_v15, %v1604_v12  ;;  %v2060_v40 = vpop.eup %2059 }
 0x3b0   :  { %v1702_v60 = vmul.f32 32.0, %v2060_v40  ;;  %vm1706_vm9 = vweird.f32 %v2060_v40 }
 0x3b1   :  { %v1597_v39 = vsub.f32 2.0, %v1593_v0 }
 0x3b2   :  { %v1703_v10 = vsub.f32 1.0, %v1702_v60 }
 0x3b3   :  { %v1601_v52 = vmul.f32 %v2058_v13, %v1597_v39 }
 0x3b4   :  { %1937 = vset.pattern.permute.xlu1 %v2087_v41  ;;  %v1704_v5 = vmul.f32 %v2060_v40, %v1703_v10 }
 0x3b5   :  { %v1605_v56 = vmul.f32 %v1601_v52, %v1585_v47  ;;  %1771 = vperm.xlu1 %1937, %v3178_v61  }
 0x3b6   :  { %1759 = vperm.xlu2 %1935, %v3185_v49   ;;  %v1705_v51 = vadd.f32 %v2060_v40, %v1704_v5 }
 0x3b7   :  { %v1625_v46 = vadd.f32 %v1620_v55, %v1605_v56 }
 0x3b8   :  { %v1707_v53 = vsel %vm1706_vm9, %v2060_v40, %v1705_v51 }
 0x3b9   :  { %1666 = vmatpush.msrb.mxu0 %v1625_v46 }
 0x3bb   :  { %1667 = vmatpush.msrb.mxu0 %v1624_v32 }
 0x3bd   :  { %1668 = vmatpush.msrb.mxu0 %v1623_v36  ;;  %1779 = vperm.xlu1 %1937, %v3185_v49   ;;  %v2080_v49 = vld [vmem:[%s3286_s0] sm:$0xff] }
 0x3be   :  { %1938 = vset.pattern.permute.xlu2 %v2087_v41 }
 0x3bf   :  { %1669 = vmatpush.msrb.mxu0 %v1622_v45  ;;  %1775 = vperm.xlu2 %1938, %v3193_v2  }
 0x3c0   :  { %1910 = vmatmul.msk.f32.vlgmr.msrb.gmra.mxu0 %vm65_vm0, %v29_v18 }
 0x3c8   :  { %1911 = vmatmul.msk.f32.gmra.mxu0 %vm65_vm0, %v30_v6 }
 0x3d0   :  { %1912 = vmatmul.msk.f32.gmra.mxu0 %vm65_vm0, %v31_v11 }
 0x3d8   :  { %1913 = vmatmul.msk.f32.gmra.mxu0 %vm65_vm0, %v32_v42 }
 0x3f7   :  { %v1628_v35 = vpop.permute.xlu2 %1627 }
 0x3ff   :  { %v1636_v61 = vpop.permute.xlu2 %1635 }
 0x40d   :  { %v1632_v59 = vpop.permute.xlu1 %1631  ;;  %v1640_v33 = vpop.permute.xlu0 %1639 }
 0x416   :  { %v1748_v41 = vpop.permute.xlu1 %1747  ;;  %v1768_v40 = vpop.permute.xlu0 %1767 }
 0x43d   :  { %v1671_v50 = vpop.f32.mrf.mxu0 }
 0x43e   :  { %v1672_v22 = vadd.f32 %v1671_v50, %v1628_v35  ;;  %v1756_v35 = vpop.permute.xlu1 %1755 }
 0x440   :  { %v1683_v2 = vadd.f32 %v2080_v49, %v1672_v22 }
 0x442   :  { %v1688_v31 = vsel %vm1687_vm8, %v1683_v2, 0.0 }
 0x445   :  { %v1674_v28 = vpop.f32.mrf.mxu0 }
 0x446   :  { %v1675_v29 = vadd.f32 %v1674_v28, %v1632_v59  ;;  %v1752_v28 = vpop.permute.xlu2 %1751  ;;  %v1772_v22 = vpop.permute.xlu1 %1771 }
 0x448   :  { %v1684_v3 = vadd.f32 %v2079_v27, %v1675_v29 }
 0x44a   :  { %v1689_v43 = vsel %vm1687_vm8, %v1684_v3, 0.0 }
 0x44b   :  { %v1690_v19 = vadd.f32 %v1689_v43, %v1688_v31 }
 0x44d   :  { %v1677_v38 = vpop.f32.mrf.mxu0 }
 0x44e   :  { %v1678_v24 = vadd.f32 %v1677_v38, %v1636_v61  ;;  %v1760_v34 = vpop.permute.xlu2 %1759 }
 0x450   :  { %v1685_v7 = vadd.f32 %v2081_v30, %v1678_v24 }
 0x452   :  { %v1691_v14 = vsel %vm1687_vm8, %v1685_v7, 0.0 }
 0x453   :  { %v1692_v48 = vadd.f32 %v1691_v14, %v1690_v19 }
 0x455   :  { %v1680_v8 = vpop.f32.mrf.mxu0 }
 0x456   :  { %v1681_v62 = vadd.f32 %v1680_v8, %v1640_v33  ;;  %v1776_v33 = vpop.permute.xlu2 %1775 }
 0x458   :  { %v1686_v17 = vadd.f32 %v2082_v54, %v1681_v62  ;;  %v1780_v54 = vpop.permute.xlu1 %1779 }
 0x45a   :  { %v1693_v20 = vsel %vm1687_vm8, %v1686_v17, 0.0 }
 0x45b   :  { %v1694_v63 = vadd.f32 %v1693_v20, %v1692_v48 }
 0x45d   :  { %v1695_v37 = vrot.slane %v1694_v63, 4 }
 0x45f   :  { %v1696_v21 = vadd.f32 %v1695_v37, %v1694_v63 }
 0x461   :  { %v1697_v9 = vrot.slane %v1696_v21, 2 }
 0x463   :  { %v1698_v4 = vadd.f32 %v1697_v9, %v1696_v21 }
 0x465   :  { %v1699_v47 = vrot.slane %v1698_v4, 1 }
 0x467   :  { %v1700_v25 = vadd.f32 %v1699_v47, %v1698_v4 }
 0x469   :  { %v1708_v26 = vmul.f32 %v1707_v53, %v1700_v25 }
 0x46b   :  { %v1710_v57 = vsub.f32 %v1684_v3, %v1708_v26  ;;  %v1711_v1 = vsub.f32 %v1685_v7, %v1708_v26  ;;  %v1712_v55 = vsub.f32 %v1686_v17, %v1708_v26  ;;  %v1709_v12 = vsub.f32 %v1683_v2, %v1708_v26 }
 0x46d   :  { %v1713_v13 = vmul.f32 %v1709_v12, %v1709_v12  ;;  %v1714_v0 = vmul.f32 %v1710_v57, %v1710_v57  ;;  %v1715_v39 = vmul.f32 %v1711_v1, %v1711_v1  ;;  %v1716_v52 = vmul.f32 %v1712_v55, %v1712_v55 }
 0x46f   :  { %v1717_v56 = vsel %vm1687_vm8, %v1713_v13, 0.0  ;;  %v1718_v15 = vsel %vm1687_vm8, %v1714_v0, 0.0  ;;  %v1720_v44 = vsel %vm1687_vm8, %v1715_v39, 0.0  ;;  %v1722_v32 = vsel %vm1687_vm8, %v1716_v52, 0.0 }
 0x470   :  { %v1719_v46 = vadd.f32 %v1718_v15, %v1717_v56 }
 0x472   :  { %v1721_v16 = vadd.f32 %v1720_v44, %v1719_v46 }
 0x474   :  { %v1723_v58 = vadd.f32 %v1722_v32, %v1721_v16 }
 0x476   :  { %v1724_v36 = vrot.slane %v1723_v58, 4 }
 0x478   :  { %v1725_v45 = vadd.f32 %v1724_v36, %v1723_v58 }
 0x47a   :  { %v1726_v18 = vrot.slane %v1725_v45, 2 }
 0x47c   :  { %v1727_v23 = vadd.f32 %v1726_v18, %v1725_v45 }
 0x47e   :  { %v1728_v6 = vrot.slane %v1727_v23, 1 }
 0x480   :  { %v1729_v11 = vadd.f32 %v1728_v6, %v1727_v23 }
 0x482   :  { %v1730_v42 = vmul.f32 %v1729_v11, %v1707_v53 }
 0x484   :  { %v1731_v50 = vadd.f32 1e-05, %v1730_v42 }
 0x486   :  { %2061 = vrsqrt.f32 %v1731_v50  ;;  %vm1738_vm11 = vweird.f32 %v1731_v50 }
 0x48c   :  { %v2062_v59 = vpop.eup %2061 }
 0x48d   :  { %v1733_v29 = vmul.f32 %v2062_v59, %v1731_v50  ;;  %vm1739_vm10 = vweird.f32 %v2062_v59 }
 0x48e   :  { %vm1740_vm12 = vmor %vm1738_vm11, %vm1739_vm10 }
 0x48f   :  { %v1734_v38 = vmul.f32 %v2062_v59, %v1733_v29 }
 0x491   :  { %v1735_v61 = vmul.f32 0.5, %v1734_v38 }
 0x493   :  { %v1736_v24 = vsub.f32 1.5, %v1735_v61 }
 0x495   :  { %v1737_v27 = vmul.f32 %v2062_v59, %v1736_v24 }
 0x497   :  { %v1741_v3 = vsel %vm1740_vm12, %v2062_v59, %v1737_v27 }
 0x498   :  { %v1742_v49 = vmul.f32 %v1741_v3, %v1709_v12  ;;  %v1743_v2 = vmul.f32 %v1741_v3, %v1710_v57  ;;  %v1744_v30 = vmul.f32 %v1741_v3, %v1711_v1  ;;  %v1745_v7 = vmul.f32 %v1741_v3, %v1712_v55 }
 0x49a   :  { %v1762_v43 = vmul.f32 %v1748_v41, %v1742_v49  ;;  %v1763_v8 = vmul.f32 %v1752_v28, %v1743_v2  ;;  %v1764_v31 = vmul.f32 %v1756_v35, %v1744_v30  ;;  %v1765_v14 = vmul.f32 %v1760_v34, %v1745_v7 }
 0x49c   :  { %v1783_v62 = vadd.f32 %v1772_v22, %v1763_v8  ;;  %v1782_v60 = vadd.f32 %v1768_v40, %v1762_v43  ;;  %v1784_v19 = vadd.f32 %v1776_v33, %v1764_v31  ;;  %v1785_v17 = vadd.f32 %v1780_v54, %v1765_v14 }
 0x49e   :  { %1787 = vst.msk [vmem:[%s3290_s4 + $0x8] sm:$0xff] %vm1687_vm8, %v1783_v62 }
 0x49f   :  { %1786 = vst.msk [vmem:[%s3290_s4] sm:$0xff] %vm1687_vm8, %v1782_v60 }
 0x4a0   :  { %1788 = vst.msk [vmem:[%s3290_s4 + $0x10] sm:$0xff] %vm1687_vm8, %v1784_v19 }
 0x4a1   :  { %1789 = vst.msk [vmem:[%s3290_s4 + $0x18] sm:$0xff] %vm1687_vm8, %v1785_v17 }

</bundles_post_ra>
